<compile_context>
chip_gen: v7x
topology: tpu7x:2x2x1
jax: 0.10.0
libtpu: 0.0.40
codegen_flags: <defaults>
</compile_context>

<pallas_src>
import jax
import jax.numpy as jnp
from jax import lax
from jax.experimental import pallas as pl
from jax.experimental.pallas import tpu as pltpu

_BN_EPS = 1e-5
_LANE = 128


def _round_up(n, m):
    return ((n + m - 1) // m) * m


# --------------------------------------------------------------------------- kernel
def _forward_kernel(x_ref, w1_ref, w2_ref, w3_ref, bias_ref, heads_ref, feats_ref):
    f_pad = feats_ref.shape[1]      # padded 3*hidden
    hid_pad = w2_ref.shape[1]       # padded 200 (= 100 classifier + 100 domain)
    out_pad = heads_ref.shape[1]    # padded num_classes + 2

    bias = bias_ref[...]            # (3, bias_w) packed bias slab
    x = x_ref[...]                  # (block_rows, cin_pad)

    # Fused 3-view conv (centre tap, H=W=1) with BatchNorm folded in, + ReLU.
    feat = jnp.dot(x, w1_ref[...], preferred_element_type=jnp.float32)
    feat = jnp.maximum(feat + bias[0:1, :f_pad], 0.0)
    feats_ref[...] = feat

    # Fused first layers of classifier and domain discriminator, + ReLU.
    h = jnp.dot(feat, w2_ref[...], preferred_element_type=jnp.float32)
    h = jnp.maximum(h + bias[1:2, :hid_pad], 0.0)

    # Fused (block-diagonal) second layers: Linear(100,num_classes) | Linear(100,2).
    heads_ref[...] = (jnp.dot(h, w3_ref[...], preferred_element_type=jnp.float32)
                      + bias[2:3, :out_pad])


# --------------------------------------------------------------------------- params
def init_params(key, input_channels, hidden_dim, num_classes):
    """Raw parameters in PyTorch layouts (Conv2d OIHW, Linear (out, in))."""
    ks = jax.random.split(key, 14)

    def n(k, shape, s=0.1):
        return s * jax.random.normal(k, shape, jnp.float32)

    fdim = 3 * hidden_dim
    return dict(
        conv_w=n(ks[0], (3, hidden_dim, input_channels, 3, 3)),
        conv_b=n(ks[1], (3, hidden_dim)),
        gamma=1.0 + n(ks[2], (3, hidden_dim)),
        beta=n(ks[3], (3, hidden_dim)),
        mean=n(ks[4], (3, hidden_dim)),
        var=0.5 + jnp.abs(jax.random.normal(ks[5], (3, hidden_dim), jnp.float32)),
        wc1=n(ks[6], (100, fdim), 1.0 / float(fdim) ** 0.5),
        bc1=n(ks[7], (100,), 0.05),
        wc2=n(ks[8], (num_classes, 100), 0.1),
        bc2=n(ks[9], (num_classes,), 0.05),
        wd1=n(ks[10], (100, fdim), 1.0 / float(fdim) ** 0.5),
        bd1=n(ks[11], (100,), 0.05),
        wd2=n(ks[12], (2, 100), 0.1),
        bd2=n(ks[13], (2,), 0.05),
    )


def prepare_params(raw, eps=_BN_EPS):
    """One-time BN fold + view/head fusion + lane-dense zero padding (done ONCE)."""
    _, hidden, cin = raw["conv_w"].shape[:3]
    num_classes = raw["wc2"].shape[0]
    fdim = 3 * hidden
    hid = raw["wc1"].shape[0] + raw["wd1"].shape[0]          # 200

    # Fold BatchNorm (inference) into the conv centre tap (valid because H = W = 1).
    scale = raw["gamma"] / jnp.sqrt(raw["var"] + eps)                 # (3, hidden)
    w_ctr = raw["conv_w"][:, :, :, 1, 1]                              # (3, hidden, cin)
    w_fold = w_ctr * scale[:, :, None]                                # (3, hidden, cin)
    b_fold = (raw["conv_b"] - raw["mean"]) * scale + raw["beta"]      # (3, hidden)

    # Three view convs as one matmul: (cin, 3*hidden), column blocks per view.
    w1 = jnp.concatenate([w_fold[v].T for v in range(3)], axis=1)
    b1 = b_fold.reshape(fdim)

    # Classifier | domain first layers fused: (3*hidden, 200).
    w2 = jnp.concatenate([raw["wc1"].T, raw["wd1"].T], axis=1)
    b2 = jnp.concatenate([raw["bc1"], raw["bd1"]])

    # Block-diagonal second layers: (200, num_classes + 2).
    w3 = jnp.zeros((hid, num_classes + 2), jnp.float32)
    w3 = w3.at[:100, :num_classes].set(raw["wc2"].T)
    w3 = w3.at[100:, num_classes:].set(raw["wd2"].T)
    b3 = jnp.concatenate([raw["bc2"], raw["bd2"]])

    # Zero-pad once to lane-dense 128-multiples (unmasked loads/stores, full vregs).
    cin_pad = _round_up(cin, _LANE)
    f_pad = _round_up(fdim, _LANE)
    hid_pad = _round_up(hid, _LANE)
    out_pad = _round_up(num_classes + 2, _LANE)
    bias_w = max(f_pad, hid_pad, out_pad)

    def pad2(a, r, c):
        return jnp.zeros((r, c), jnp.float32).at[:a.shape[0], :a.shape[1]].set(a)

    bias = jnp.zeros((3, bias_w), jnp.float32)
    bias = bias.at[0, :fdim].set(b1)
    bias = bias.at[1, :hid].set(b2)
    bias = bias.at[2, :num_classes + 2].set(b3)

    return dict(
        w1=pad2(w1, cin_pad, f_pad),
        w2=pad2(w2, f_pad, hid_pad),
        w3=pad2(w3, hid_pad, out_pad),
        bias=bias,
        cin=cin, hidden=hidden, num_classes=num_classes,
        cin_pad=cin_pad, f_pad=f_pad, hid_pad=hid_pad, out_pad=out_pad,
    )


# --------------------------------------------------------------------------- forward
def cross_scene_classifier_forward(prepared, x_nchw):
    b, cin, h, w = x_nchw.shape
    assert h == 1 and w == 1, "module's Linear(hidden_dim*3) requires H*W == 1"
    assert cin == prepared["cin"]
    hidden = prepared["hidden"]
    nc = prepared["num_classes"]
    cin_pad, f_pad = prepared["cin_pad"], prepared["f_pad"]
    hid_pad, out_pad = prepared["hid_pad"], prepared["out_pad"]
    bias_w = prepared["bias"].shape[1]

    # Row (batch) padding / tiling: multiple of 8 sublanes; large batches get a
    # "parallel" row grid so both v7x TensorCores are used.
    b_pad = _round_up(b, 8)
    if b_pad > 512:
        block_rows = 512
        b_pad = _round_up(b_pad, block_rows)
    else:
        block_rows = b_pad
    grid = (b_pad // block_rows,)

    x2 = x_nchw.reshape(b, cin).astype(jnp.float32)
    x_pad = jnp.zeros((b_pad, cin_pad), jnp.float32).at[:b, :cin].set(x2)

    heads_pad, feats_pad = pl.pallas_call(
        _forward_kernel,
        out_shape=(
            jax.ShapeDtypeStruct((b_pad, out_pad), jnp.float32),  # class | domain slab
            jax.ShapeDtypeStruct((b_pad, f_pad), jnp.float32),    # feat1|feat2|feat3 slab
        ),
        grid=grid,
        in_specs=[
            pl.BlockSpec((block_rows, cin_pad), lambda i: (i, 0)),
            pl.BlockSpec((cin_pad, f_pad), lambda i: (0, 0)),
            pl.BlockSpec((f_pad, hid_pad), lambda i: (0, 0)),
            pl.BlockSpec((hid_pad, out_pad), lambda i: (0, 0)),
            pl.BlockSpec((3, bias_w), lambda i: (0, 0)),
        ],
        out_specs=(
            pl.BlockSpec((block_rows, out_pad), lambda i: (i, 0)),
            pl.BlockSpec((block_rows, f_pad), lambda i: (i, 0)),
        ),
        compiler_params=pltpu.CompilerParams(dimension_semantics=("parallel",)),
    )(x_pad, prepared["w1"], prepared["w2"], prepared["w3"], prepared["bias"])

    class_out = heads_pad[:b, :nc]
    domain_out = heads_pad[:b, nc:nc + 2]

    def view_feat(v):  # back to PyTorch NCHW feature maps, H = W = 1
        return feats_pad[:b, v * hidden:(v + 1) * hidden].reshape(b, hidden, 1, 1)

    return class_out, domain_out, view_feat(0), view_feat(1), view_feat(2)


# --------------------------------------------------------------------------- reference
def _reference_forward(raw, x_nchw, eps=_BN_EPS):
    """Pure-JAX reference with the same (unfused, un-folded) math as the PyTorch module."""
    b = x_nchw.shape[0]
    x = x_nchw.astype(jnp.float32)
    feats = []
    for v in range(3):
        y = lax.conv_general_dilated(
            x, raw["conv_w"][v], window_strides=(1, 1), padding=((1, 1), (1, 1)),
            dimension_numbers=("NCHW", "OIHW", "NCHW"))
        y = y + raw["conv_b"][v][None, :, None, None]
        scale = (raw["gamma"][v] / jnp.sqrt(raw["var"][v] + eps))[None, :, None, None]
        y = (y - raw["mean"][v][None, :, None, None]) * scale + raw["beta"][v][None, :, None, None]
        feats.append(jnp.maximum(y, 0.0))
    fused = jnp.concatenate(feats, axis=1).reshape(b, -1)
    hc = jnp.maximum(fused @ raw["wc1"].T + raw["bc1"], 0.0)
    class_out = hc @ raw["wc2"].T + raw["bc2"]
    hd = jnp.maximum(fused @ raw["wd1"].T + raw["bd1"], 0.0)
    domain_out = hd @ raw["wd2"].T + raw["bd2"]
    return class_out, domain_out, feats[0], feats[1], feats[2]


# --------------------------------------------------------------------------- main
if __name__ == "__main__":
    jax.config.update("jax_default_matmul_precision", "highest")

    B, CIN, H, W = 2, 4, 1, 1        # H = W = 1 forced by the module's flatten -> Linear(hidden*3)
    HIDDEN, NUM_CLASSES = 32, 8

    key = jax.random.PRNGKey(0)
    kx, kp = jax.random.split(key)
    x = jax.random.normal(kx, (B, CIN, H, W), jnp.float32)

    raw = init_params(kp, CIN, HIDDEN, NUM_CLASSES)
    prepared = prepare_params(raw)   # BN fold / view & head fusion / lane padding — once

    fwd = jax.jit(lambda xx: cross_scene_classifier_forward(prepared, xx))
    outs = jax.block_until_ready(fwd(x))

    refs = _reference_forward(raw, x)
    names = ["class_output", "domain_output", "feat1", "feat2", "feat3"]
    for name, o, r in zip(names, outs, refs):
        assert o.shape == r.shape, (name, o.shape, r.shape)
        err = float(jnp.max(jnp.abs(o - r)))
        assert jnp.allclose(o, r, atol=1e-2, rtol=1e-2), (name, err)

    print("KERNEL_OK")
</pallas_src>

<mosaic_0001>
module attributes {stable_mosaic.version = 11 : i64} {
  func.func @_forward_kernel(%arg0: i32, %arg1: memref<8x128xf32, #tpu.memory_space<vmem>>, %arg2: memref<128x128xf32, #tpu.memory_space<vmem>>, %arg3: memref<128x256xf32, #tpu.memory_space<vmem>>, %arg4: memref<256x128xf32, #tpu.memory_space<vmem>>, %arg5: memref<3x256xf32, #tpu.memory_space<vmem>>, %arg6: memref<8x128xf32, #tpu.memory_space<vmem>>, %arg7: memref<8x128xf32, #tpu.memory_space<vmem>>) attributes {dimension_semantics = [#tpu.dimension_semantics<parallel>], iteration_bounds = array<i64: 1>, scalar_prefetch = 0 : i64, scratch_operands = 0 : i64, tpu.core_type = #tpu.core_type<tc>, window_params = [{transform_indices = @transform_0, window_bounds = array<i64: 8, 128>}, {pipeline_mode = #tpu.pipeline_mode<synchronous>, transform_indices = @transform_1, window_bounds = array<i64: 128, 128>}, {pipeline_mode = #tpu.pipeline_mode<synchronous>, transform_indices = @transform_2, window_bounds = array<i64: 128, 256>}, {pipeline_mode = #tpu.pipeline_mode<synchronous>, transform_indices = @transform_3, window_bounds = array<i64: 256, 128>}, {pipeline_mode = #tpu.pipeline_mode<synchronous>, transform_indices = @transform_4, window_bounds = array<i64: 3, 256>}, {transform_indices = @transform_5, window_bounds = array<i64: 8, 128>}, {transform_indices = @transform_6, window_bounds = array<i64: 8, 128>}]} {
    %c0 = arith.constant 0 : index
    %c0_0 = arith.constant 0 : index
    %0 = vector.load %arg5[%c0, %c0_0] : memref<3x256xf32, #tpu.memory_space<vmem>>, vector<3x256xf32>
    %c0_1 = arith.constant 0 : index
    %c0_2 = arith.constant 0 : index
    %1 = vector.load %arg1[%c0_1, %c0_2] : memref<8x128xf32, #tpu.memory_space<vmem>>, vector<8x128xf32>
    %c0_3 = arith.constant 0 : index
    %c0_4 = arith.constant 0 : index
    %2 = vector.load %arg2[%c0_3, %c0_4] : memref<128x128xf32, #tpu.memory_space<vmem>>, vector<128x128xf32>
    %cst = arith.constant dense<0.000000e+00> : vector<8x128xf32>
    %3 = tpu.matmul %1, %2, %cst {dimension_numbers = #tpu.dot_dimension_numbers<[1], [0], [0], [1], [0, 0, 1, 1], [], []>, precision = #tpu.contract_precision<fp32>} : vector<8x128xf32>, vector<128x128xf32>, vector<8x128xf32> -> vector<8x128xf32>
    %4 = vector.extract_strided_slice %0 {offsets = [0, 0], sizes = [1, 128], strides = [1, 1]} : vector<3x256xf32> to vector<1x128xf32>
    %5 = vector.broadcast %4 : vector<1x128xf32> to vector<8x128xf32>
    %6 = arith.addf %3, %5 : vector<8x128xf32>
    %cst_5 = arith.constant 0.000000e+00 : f32
    %7 = vector.broadcast %cst_5 : f32 to vector<8x128xf32>
    %8 = arith.maximumf %6, %7 : vector<8x128xf32>
    %c0_6 = arith.constant 0 : index
    %c0_7 = arith.constant 0 : index
    %9 = vector.load %arg7[%c0_6, %c0_7] : memref<8x128xf32, #tpu.memory_space<vmem>>, vector<8x128xf32>
    tpu.vector_store %arg7[%c0_6, %c0_7], %8 {strides = array<i32>} : memref<8x128xf32, #tpu.memory_space<vmem>>, vector<8x128xf32>,
    %c0_8 = arith.constant 0 : index
    %c0_9 = arith.constant 0 : index
    %10 = vector.load %arg3[%c0_8, %c0_9] : memref<128x256xf32, #tpu.memory_space<vmem>>, vector<128x256xf32>
    %cst_10 = arith.constant dense<0.000000e+00> : vector<8x256xf32>
    %11 = tpu.matmul %8, %10, %cst_10 {dimension_numbers = #tpu.dot_dimension_numbers<[1], [0], [0], [1], [0, 0, 1, 1], [], []>, precision = #tpu.contract_precision<fp32>} : vector<8x128xf32>, vector<128x256xf32>, vector<8x256xf32> -> vector<8x256xf32>
    %12 = vector.extract_strided_slice %0 {offsets = [1, 0], sizes = [1, 256], strides = [1, 1]} : vector<3x256xf32> to vector<1x256xf32>
    %13 = vector.broadcast %12 : vector<1x256xf32> to vector<8x256xf32>
    %14 = arith.addf %11, %13 : vector<8x256xf32>
    %cst_11 = arith.constant 0.000000e+00 : f32
    %15 = vector.broadcast %cst_11 : f32 to vector<8x256xf32>
    %16 = arith.maximumf %14, %15 : vector<8x256xf32>
    %c0_12 = arith.constant 0 : index
    %c0_13 = arith.constant 0 : index
    %17 = vector.load %arg4[%c0_12, %c0_13] : memref<256x128xf32, #tpu.memory_space<vmem>>, vector<256x128xf32>
    %cst_14 = arith.constant dense<0.000000e+00> : vector<8x128xf32>
    %18 = tpu.matmul %16, %17, %cst_14 {dimension_numbers = #tpu.dot_dimension_numbers<[1], [0], [0], [1], [0, 0, 1, 1], [], []>, precision = #tpu.contract_precision<fp32>} : vector<8x256xf32>, vector<256x128xf32>, vector<8x128xf32> -> vector<8x128xf32>
    %19 = vector.extract_strided_slice %0 {offsets = [2, 0], sizes = [1, 128], strides = [1, 1]} : vector<3x256xf32> to vector<1x128xf32>
    %20 = vector.broadcast %19 : vector<1x128xf32> to vector<8x128xf32>
    %21 = arith.addf %18, %20 : vector<8x128xf32>
    %c0_15 = arith.constant 0 : index
    %c0_16 = arith.constant 0 : index
    %22 = vector.load %arg6[%c0_15, %c0_16] : memref<8x128xf32, #tpu.memory_space<vmem>>, vector<8x128xf32>
    tpu.vector_store %arg6[%c0_15, %c0_16], %21 {strides = array<i32>} : memref<8x128xf32, #tpu.memory_space<vmem>>, vector<8x128xf32>,
    return
  }
  func.func @transform_0(%arg0: i32) -> (i32, i32) {
    %c0_i32 = arith.constant 0 : i32
    %c0_i32_0 = arith.constant 0 : i32
    return %arg0, %c0_i32 : i32, i32
  }
  func.func @transform_1(%arg0: i32) -> (i32, i32) {
    %c0_i32 = arith.constant 0 : i32
    %c0_i32_0 = arith.constant 0 : i32
    %c0_i32_1 = arith.constant 0 : i32
    return %c0_i32, %c0_i32_0 : i32, i32
  }
  func.func @transform_2(%arg0: i32) -> (i32, i32) {
    %c0_i32 = arith.constant 0 : i32
    %c0_i32_0 = arith.constant 0 : i32
    %c0_i32_1 = arith.constant 0 : i32
    return %c0_i32, %c0_i32_0 : i32, i32
  }
  func.func @transform_3(%arg0: i32) -> (i32, i32) {
    %c0_i32 = arith.constant 0 : i32
    %c0_i32_0 = arith.constant 0 : i32
    %c0_i32_1 = arith.constant 0 : i32
    return %c0_i32, %c0_i32_0 : i32, i32
  }
  func.func @transform_4(%arg0: i32) -> (i32, i32) {
    %c0_i32 = arith.constant 0 : i32
    %c0_i32_0 = arith.constant 0 : i32
    %c0_i32_1 = arith.constant 0 : i32
    return %c0_i32, %c0_i32_0 : i32, i32
  }
  func.func @transform_5(%arg0: i32) -> (i32, i32) {
    %c0_i32 = arith.constant 0 : i32
    %c0_i32_0 = arith.constant 0 : i32
    return %arg0, %c0_i32 : i32, i32
  }
  func.func @transform_6(%arg0: i32) -> (i32, i32) {
    %c0_i32 = arith.constant 0 : i32
    %c0_i32_0 = arith.constant 0 : i32
    return %arg0, %c0_i32 : i32, i32
  }
}

</mosaic_0001>

<bundles_post_ra>
// kernel: _lambda_.1
= control target key start
LH: loop header
LB: loop body
LE: loop exit
PB: predicated region body
PF: predicated region fallthrough
CT: control target
= control target key end

     0   :  { %12 = vsyncpa [#allocation3], 0  ;;  %s4955_s0 = inlined_call_operand.vmem [shape: f32[8,128], index: 0, kind: input, shape index: {}]   ;;  %s4956_s1 = inlined_call_operand.hbm [shape: f32[128,128], index: 1, kind: input, shape index: {}]   ;;  %s4957_s2 = inlined_call_operand.hbm [shape: f32[128,256], index: 2, kind: input, shape index: {}]   ;;  %s4958_s3 = inlined_call_operand.hbm [shape: f32[256,128], index: 3, kind: input, shape index: {}]   ;;  %s4959_s4 = inlined_call_operand.vmem [shape: f32[3,256], index: 4, kind: input, shape index: {}]   ;;  %s4960_s5 = inlined_call_operand.vmem [shape: f32[8,128], index: 5, kind: output, shape index: {0}]   ;;  %s4961_s6 = inlined_call_operand.vmem [shape: f32[8,128], index: 6, kind: output, shape index: {1}]  }
   0x1   :  { %13 = vsyncpa [#allocation5], 0  ;;  %s3698_s21 = smov [#allocation4]   ;;  %s3628_s25 = scalar_lea.hbm %s4957_s2, 4096 }
   0x2   :  { %s33_s22 = sshll.u32 %s3698_s21, 4  ;;  %p3629_p0 = scmp.ne.s32.totalorder %s4957_s2, %s3628_s25  ;;  %s34_s22 = int_to_ptr.vmem [resolvable:$true] %s33_s22 }
   0x3   :  { %p3632_p1 = scmp.lt.u32.totalorder %s3628_s25, %s4957_s2 }
   0x5   :  { %p3634_p2 = pnand %p3632_p1, %p3629_p0 }
   0x7   :  { %3637 = shalt.err (!%p3634_p2)
}
   0x8   :  { %s3638_s30 = scalar_lea.vmem %s34_s22, 4096  ;;  %p3643_p4 = scmp.lt.s32.totalorder %s34_s22, %s34_s22 }
   0x9   :  { %p3639_p3 = scmp.ne.s32.totalorder %s34_s22, %s3638_s30  ;;  %p3644_p5 = scmp.lt.s32.totalorder %s3638_s30, %s3638_s30 }
   0xb   :  { %p3645_p6 = por %p3644_p5, %p3643_p4 }
   0xd   :  { %p3646_p7 = pnand %p3645_p6, %p3639_p3 }
   0xf   :  { %3649 = shalt.err (!%p3646_p7)
}
  0x10   :  { %s3699_s7 = smov 256   ;;  %s3700_s8 = smov 16  }
  0x11   :  { %39 = dma.hbm_to_vmem [thread:$0]  %s4957_s2, 4096, %s34_s22, [#allocation5], %s3699_s7, %s3699_s7, %s3700_s8  }
  0x12   :  { %s3701_s11 = smov [#allocation2]   ;;  %s3650_s15 = scalar_lea.hbm %s4956_s1, 2048 }
  0x13   :  { %s21_s12 = sshll.u32 %s3701_s11, 4  ;;  %p3651_p8 = scmp.ne.s32.totalorder %s4956_s1, %s3650_s15  ;;  %s22_s12 = int_to_ptr.vmem [resolvable:$true] %s21_s12 }
  0x14   :  { %p3654_p9 = scmp.lt.u32.totalorder %s3650_s15, %s4956_s1 }
  0x16   :  { %p3656_p10 = pnand %p3654_p9, %p3651_p8 }
  0x18   :  { %3659 = shalt.err (!%p3656_p10)
}
  0x19   :  { %s3660_s20 = scalar_lea.vmem %s22_s12, 2048  ;;  %p3665_p12 = scmp.lt.s32.totalorder %s22_s12, %s22_s12 }
  0x1a   :  { %p3661_p11 = scmp.ne.s32.totalorder %s22_s12, %s3660_s20  ;;  %p3666_p13 = scmp.lt.s32.totalorder %s3660_s20, %s3660_s20 }
  0x1c   :  { %p3667_p0 = por %p3666_p13, %p3665_p12 }
  0x1e   :  { %p3668_p1 = pnand %p3667_p0, %p3661_p11 }
  0x20   :  { %3671 = shalt.err (!%p3668_p1)
}
  0x21   :  { %s3702_s2 = smov 128   ;;  %s3703_s21 = smov 8  }
  0x22   :  { %27 = dma.hbm_to_vmem [thread:$0]  %s4956_s1, 2048, %s22_s12, [#allocation3], %s3702_s2, %s3702_s2, %s3703_s21  }
  0x23   :  { %s3704_s24 = smov [#allocation6]   ;;  %s3672_s28 = scalar_lea.hbm %s4958_s3, 4096 }
  0x24   :  { %s45_s25 = sshll.u32 %s3704_s24, 4  ;;  %p3673_p2 = scmp.ne.s32.totalorder %s4958_s3, %s3672_s28  ;;  %s46_s25 = int_to_ptr.vmem [resolvable:$true] %s45_s25 }
  0x25   :  { %p3676_p3 = scmp.lt.u32.totalorder %s3672_s28, %s4958_s3 }
  0x27   :  { %p3678_p4 = pnand %p3676_p3, %p3673_p2 }
  0x29   :  { %3681 = shalt.err (!%p3678_p4)
}
  0x2a   :  { %s3682_s9 = scalar_lea.vmem %s46_s25, 4096  ;;  %p3687_p6 = scmp.lt.s32.totalorder %s46_s25, %s46_s25 }
  0x2b   :  { %p3683_p5 = scmp.ne.s32.totalorder %s46_s25, %s3682_s9  ;;  %p3688_p7 = scmp.lt.s32.totalorder %s3682_s9, %s3682_s9 }
  0x2d   :  { %p3689_p8 = por %p3688_p7, %p3687_p6 }
  0x2f   :  { %p3690_p9 = pnand %p3689_p8, %p3683_p5 }
  0x31   :  { %3693 = shalt.err (!%p3690_p9)
}
  0x32   :  { %51 = dma.hbm_to_vmem [thread:$0]  %s4958_s3, 4096, %s46_s25, [#allocation5], %s3702_s2, %s3702_s2, %s3703_s21  }
  0x33   :  { %3694 = dma.done.wait [#allocation3], 2048  }
  0x34   :  { %3695 = vsyncadd [#allocation3], 4294965248 }
  0x35   :  { %3696 = dma.done.wait [#allocation5], 8192  }
  0x36   :  { %3697 = vsyncadd [#allocation5], 4294959104  ;;  %v4965_v0 = vmov 0.0|0.0   ;;  %vm3706_vm0 = vmmov 0   ;;  %v4963_v1 = vmov 0.0   ;;  %v65_v2 = vld [vmem:[#allocation2] sm:$0xff] }
  0x37   :  { %3067 = vmatprep.subr.bf16.mxu0 %v4965_v0  ;;  %2889 = vmatprep.mubr.msk.f32.mxu0 %vm3706_vm0, %v4963_v1  ;;  %v66_v3 = vld [vmem:[#allocation2 + $0x8] sm:$0xff]  ;;  %v67_v4 = vld [vmem:[#allocation2 + $0x10] sm:$0xff]  ;;  %v86_v5 = vand.u32 4294901760, %v65_v2  ;;  %v68_v7 = vld [vmem:[#allocation2 + $0x18] sm:$0xff] }
  0x38   :  { %875 = vmatprep.mubr.f32.mxu1 %v4963_v1  ;;  %v89_v6 = vand.u32 4294901760, %v66_v3  ;;  %v92_v8 = vand.u32 4294901760, %v67_v4  ;;  %v95_v9 = vand.u32 4294901760, %v68_v7  ;;  %v69_v10 = vld [vmem:[#allocation2 + $0x20] sm:$0xff]  ;;  %v70_v11 = vld [vmem:[#allocation2 + $0x28] sm:$0xff]  ;;  %v71_v16 = vld [vmem:[#allocation2 + $0x30] sm:$0xff] }
  0x39   :  { %v98_v14 = vand.u32 4294901760, %v69_v10  ;;  %v101_v15 = vand.u32 4294901760, %v70_v11  ;;  %v72_v17 = vld [vmem:[#allocation2 + $0x38] sm:$0xff]  ;;  %v104_v19 = vand.u32 4294901760, %v71_v16  ;;  %v73_v21 = vld [vmem:[#allocation2 + $0x40] sm:$0xff]  ;;  %v74_v22 = vld [vmem:[#allocation2 + $0x48] sm:$0xff]  ;;  %v3796_v24 = vsub.f32 %v65_v2, %v86_v5 }
  0x3a   :  { %v3783_v12 = vpack.c.bf16 %v89_v6, %v86_v5  ;;  %v3786_v13 = vpack.c.bf16 %v95_v9, %v92_v8  ;;  %v107_v20 = vand.u32 4294901760, %v72_v17  ;;  %v64_v23 = vld [vmem:[%s4955_s0] sm:$0xff]  ;;  %v3798_v25 = vsub.f32 %v66_v3, %v89_v6  ;;  %v75_v29 = vld [vmem:[#allocation2 + $0x50] sm:$0xff]  ;;  %v76_v30 = vld [vmem:[#allocation2 + $0x58] sm:$0xff] }
  0x3b   :  { %v3790_v18 = vpack.c.bf16 %v101_v15, %v98_v14  ;;  %v110_v27 = vand.u32 4294901760, %v73_v21  ;;  %v113_v28 = vand.u32 4294901760, %v74_v22  ;;  %v3804_v31 = vand.u32 4294901760, %v64_v23  ;;  %v77_v32 = vld [vmem:[#allocation2 + $0x60] sm:$0xff]  ;;  %v78_v35 = vld [vmem:[#allocation2 + $0x68] sm:$0xff]  ;;  %v79_v36 = vld [vmem:[#allocation2 + $0x70] sm:$0xff] }
  0x3c   :  { %3069 = vmatpush3.bf16.msra.mxu0 %v3783_v12  ;;  %v3801_v26 = vpack.c.bf16 %v107_v20, %v104_v19  ;;  %v3806_v33 = vsub.f32 %v67_v4, %v92_v8  ;;  %v116_v34 = vand.u32 4294901760, %v75_v29  ;;  %v80_v37 = vld [vmem:[#allocation2 + $0x78] sm:$0xff]  ;;  %v119_v39 = vand.u32 4294901760, %v76_v30 }
  0x3d   :  { %3070 = vmatprep.subr.bf16.mxu0 %v4965_v0  ;;  %v3809_v38 = vpack.c.bf16 %v113_v28, %v110_v27  ;;  %v179_v40 = vand.u32 4294901760, %v3796_v24  ;;  %v186_v41 = vand.u32 4294901760, %v3798_v25  ;;  %v3813_v42 = vsub.f32 %v68_v7, %v95_v9 }
  0x3e   :  { %v3815_v43 = vsub.f32 %v69_v10, %v98_v14  ;;  %v3817_v44 = vsub.f32 %v70_v11, %v101_v15  ;;  %v3821_v45 = vsub.f32 %v64_v23, %v3804_v31  ;;  %v122_v46 = vand.u32 4294901760, %v77_v32 }
  0x3f   :  { %v125_v47 = vand.u32 4294901760, %v78_v35  ;;  %v128_v48 = vand.u32 4294901760, %v79_v36  ;;  %v131_v49 = vand.u32 4294901760, %v80_v37  ;;  %v3823_v50 = vsub.f32 %v71_v16, %v104_v19 }
  0x40   :  { %3072 = vmatpush3.bf16.msra.mxu0 %v3786_v13  ;;  %v3825_v51 = vsub.f32 %v72_v17, %v107_v20  ;;  %v3827_v52 = vsub.f32 %v73_v21, %v110_v27  ;;  %v193_v53 = vand.u32 4294901760, %v3806_v33  ;;  %v3831_v54 = vsub.f32 %v74_v22, %v113_v28 }
  0x41   :  { %3073 = vmatprep.subr.bf16.mxu0 %v4965_v0  ;;  %v3833_v55 = vpack.c.bf16 %v119_v39, %v116_v34  ;;  %v180_v56 = vsub.f32 %v3796_v24, %v179_v40  ;;  %v187_v57 = vsub.f32 %v3798_v25, %v186_v41  ;;  %v3838_v58 = vsub.f32 %v75_v29, %v116_v34 }
  0x42   :  { %v3840_v59 = vsub.f32 %v76_v30, %v119_v39  ;;  %v3842_v60 = vsub.f32 %v77_v32, %v122_v46  ;;  %v4962_v61 = vand.u32 4294901760, %v3821_v45  ;;  %v3845_v62 = vpack.c.bf16 %v125_v47, %v122_v46 }
  0x43   :  { %v3847_v63 = vsub.f32 %v78_v35, %v125_v47  ;;  %v3849_v2 = vpack.c.bf16 %v131_v49, %v128_v48  ;;  %v3851_v3 = vsub.f32 %v79_v36, %v128_v48  ;;  %v3853_v4 = vsub.f32 %v80_v37, %v131_v49 }
  0x44   :  { %3075 = vmatpush3.bf16.msra.mxu0 %v3790_v18  ;;  %v194_v5 = vsub.f32 %v3806_v33, %v193_v53  ;;  %v200_v6 = vand.u32 4294901760, %v3813_v42  ;;  %v207_v7 = vand.u32 4294901760, %v3815_v43  ;;  %v181_v8 = vand.u32 4294901760, %v180_v56 }
  0x45   :  { %3076 = vmatprep.subr.bf16.mxu0 %v4965_v0  ;;  %v188_v9 = vand.u32 4294901760, %v187_v57  ;;  %v214_v10 = vand.u32 4294901760, %v3817_v44  ;;  %v221_v11 = vand.u32 4294901760, %v3823_v50  ;;  %v169_v14 = vsub.f32 %v3821_v45, %v4962_v61  ;;  %v747_v61 = vld [vmem:[#allocation4 + $0x98] sm:$0xff] }
  0x46   :  { %v228_v15 = vand.u32 4294901760, %v3825_v51  ;;  %v235_v16 = vand.u32 4294901760, %v3827_v52  ;;  %v242_v17 = vand.u32 4294901760, %v3831_v54  ;;  %v249_v19 = vand.u32 4294901760, %v3838_v58 }
  0x47   :  { %v256_v20 = vand.u32 4294901760, %v3840_v59  ;;  %v263_v21 = vand.u32 4294901760, %v3842_v60  ;;  %v270_v22 = vand.u32 4294901760, %v3847_v63  ;;  %v277_v23 = vand.u32 4294901760, %v3851_v3 }
  0x48   :  { %3078 = vmatpush3.bf16.msra.mxu0 %v3801_v26  ;;  %v284_v27 = vand.u32 4294901760, %v3853_v4  ;;  %v3874_v28 = vpack.c.bf16 %v186_v41, %v179_v40  ;;  %v3876_v29 = vpack.c.bf16 %v200_v6, %v193_v53  ;;  %v201_v30 = vsub.f32 %v3813_v42, %v200_v6 }
  0x49   :  { %3079 = vmatprep.subr.bf16.mxu0 %v4965_v0  ;;  %v3880_v32 = vpack.c.bf16 %v214_v10, %v207_v7  ;;  %v3882_v34 = vpack.c.bf16 %v228_v15, %v221_v11  ;;  %v3884_v35 = vpack.c.bf16 %v242_v17, %v235_v16  ;;  %v3887_v36 = vpack.c.bf16 %v256_v20, %v249_v19 }
  0x4a   :  { %v3889_v37 = vpack.c.bf16 %v270_v22, %v263_v21  ;;  %v3891_v39 = vpack.c.bf16 %v284_v27, %v277_v23  ;;  %v170_v40 = vand.u32 4294901760, %v169_v14  ;;  %v195_v41 = vand.u32 4294901760, %v194_v5 }
  0x4b   :  { %v3092_v46 = vpack.c.bf16 %v188_v9, %v181_v8  ;;  %v202_v47 = vand.u32 4294901760, %v201_v30  ;;  %v208_v48 = vsub.f32 %v3815_v43, %v207_v7  ;;  %v215_v49 = vsub.f32 %v3817_v44, %v214_v10 }
  0x4c   :  { %3081 = vmatpush3.bf16.msra.mxu0 %v3809_v38  ;;  %v222_v53 = vsub.f32 %v3823_v50, %v221_v11  ;;  %v229_v14 = vsub.f32 %v3825_v51, %v228_v15  ;;  %v236_v5 = vsub.f32 %v3827_v52, %v235_v16  ;;  %v243_v10 = vsub.f32 %v3831_v54, %v242_v17 }
  0x4d   :  { %3082 = vmatprep.subr.bf16.mxu0 %v4965_v0  ;;  %v3095_v56 = vpack.c.bf16 %v202_v47, %v195_v41  ;;  %v209_v57 = vand.u32 4294901760, %v208_v48  ;;  %v216_v6 = vand.u32 4294901760, %v215_v49  ;;  %v250_v15 = vsub.f32 %v3838_v58, %v249_v19 }
  0x4e   :  { %v223_v8 = vand.u32 4294901760, %v222_v53  ;;  %v230_v9 = vand.u32 4294901760, %v229_v14  ;;  %v237_v11 = vand.u32 4294901760, %v236_v5  ;;  %v257_v41 = vsub.f32 %v3840_v59, %v256_v20  ;;  %v731_v5 = vld [vmem:[#allocation4 + $0x18] sm:$0xff] }
  0x4f   :  { %v3098_v7 = vpack.c.bf16 %v216_v6, %v209_v57  ;;  %v264_v16 = vsub.f32 %v3842_v60, %v263_v21  ;;  %v251_v47 = vand.u32 4294901760, %v250_v15  ;;  %v271_v17 = vsub.f32 %v3847_v63, %v270_v22 }
  0x50   :  { %3084 = vmatpush3.bf16.msra.mxu0 %v3833_v55  ;;  %v3101_v30 = vpack.c.bf16 %v230_v9, %v223_v8  ;;  %v258_v48 = vand.u32 4294901760, %v257_v41  ;;  %v278_v19 = vsub.f32 %v3851_v3, %v277_v23  ;;  %v285_v20 = vsub.f32 %v3853_v4, %v284_v27  ;;  %v729_v27 = vld [vmem:[#allocation4 + $0x8] sm:$0xff]  ;;  %v732_v41 = vld [vmem:[#allocation4 + $0x20] sm:$0xff] }
  0x51   :  { %3085 = vmatprep.subr.bf16.mxu0 %v4965_v0  ;;  %v265_v49 = vand.u32 4294901760, %v264_v16  ;;  %v3116_v14 = vpack.c.bf16 %v3798_v25, %v3796_v24  ;;  %v3119_v23 = vpack.c.bf16 %v3813_v42, %v3806_v33  ;;  %v3122_v8 = vpack.c.bf16 %v3817_v44, %v3815_v43  ;;  %v730_v24 = vld [vmem:[#allocation4 + $0x10] sm:$0xff]  ;;  %v737_v43 = vld [vmem:[#allocation4 + $0x48] sm:$0xff] }
  0x52   :  { %v3107_v53 = vpack.c.bf16 %v258_v48, %v251_v47  ;;  %v279_v57 = vand.u32 4294901760, %v278_v19  ;;  %v286_v6 = vand.u32 4294901760, %v285_v20  ;;  %v779_v9 = vand.u32 4294901760, %v729_v27  ;;  %v734_v16 = vld [vmem:[#allocation4 + $0x30] sm:$0xff] }
  0x53   :  { %v785_v42 = vand.u32 4294901760, %v730_v24 }
  0x54   :  { %3087 = vmatpush3.bf16.msra.mxu0 %v3845_v62  ;;  %v3113_v22 = vpack.c.bf16 %v286_v6, %v279_v57  ;;  %v741_v57 = vld [vmem:[#allocation4 + $0x68] sm:$0xff] }
  0x55   :  { %3088 = vmatprep.subr.bf16.mxu0 %v4965_v0  ;;  %v3939_v19 = vsub.f32 %v730_v24, %v785_v42  ;;  %v803_v24 = vand.u32 4294901760, %v741_v57 }
  0x58   :  { %3090 = vmatpush3.bf16.msra.mxu0 %v3849_v2 }
  0x59   :  { %3091 = vmatprep.subr.bf16.mxu0 %v4965_v0 }
  0x5b   :  { %2890 = vmatmul.mubr.f32.vlgmr.msra.gmra.mrb[0].mxu0 %v170_v40  ;;  %v244_v40 = vand.u32 4294901760, %v243_v10  ;;  %v783_v10 = vand.u32 4294901760, %v731_v5 }
  0x5c   :  { %3093 = vmatpush3.bf16.msra.mxu0 %v3092_v46  ;;  %2924 = vmatprep.mubr.msk.f32.mxu0 %vm3706_vm0, %v4963_v1 }
  0x5d   :  { %3094 = vmatprep.subr.bf16.mxu0 %v4965_v0  ;;  %v3104_v46 = vpack.c.bf16 %v244_v40, %v237_v11  ;;  %v733_v11 = vld [vmem:[#allocation4 + $0x28] sm:$0xff]  ;;  %v3929_v44 = vpack.c.bf16 %v783_v10, %v779_v9  ;;  %v3933_v47 = vsub.f32 %v731_v5, %v783_v10  ;;  %v743_v5 = vld [vmem:[#allocation4 + $0x78] sm:$0xff] }
  0x5e   :  { %v787_v40 = vand.u32 4294901760, %v733_v11 }
  0x5f   :  { %5105 = vst [vmem:[#allocation9_spill] sm:$0xff] %v3929_v44  ;;  %3212 = vmatprep.subr.bf16.mxu1 %v3929_v44 }
  0x60   :  { %3096 = vmatpush3.bf16.msra.mxu0 %v3095_v56  ;;  %v272_v56 = vand.u32 4294901760, %v271_v17  ;;  %v739_v17 = vld [vmem:[#allocation4 + $0x58] sm:$0xff] }
  0x61   :  { %3097 = vmatprep.subr.bf16.mxu0 %v4965_v0 }
  0x62   :  { %v3110_v21 = vpack.c.bf16 %v272_v56, %v265_v49  ;;  %v736_v49 = vld [vmem:[#allocation4 + $0x40] sm:$0xff] }
  0x64   :  { %3099 = vmatpush3.bf16.msra.mxu0 %v3098_v7  ;;  %v728_v7 = vld [vmem:[#allocation4] sm:$0xff] }
  0x65   :  { %3100 = vmatprep.subr.bf16.mxu0 %v4965_v0  ;;  %v781_v25 = vand.u32 4294901760, %v728_v7 }
  0x67   :  { %v3935_v48 = vsub.f32 %v728_v7, %v781_v25  ;;  %v3937_v56 = vpack.c.bf16 %v785_v42, %v781_v25  ;;  %v799_v7 = vand.u32 4294901760, %v739_v17  ;;  %v740_v25 = vld [vmem:[#allocation4 + $0x60] sm:$0xff] }
  0x68   :  { %3102 = vmatpush3.bf16.msra.mxu0 %v3101_v30  ;;  %v735_v30 = vld [vmem:[#allocation4 + $0x38] sm:$0xff] }
  0x69   :  { %3103 = vmatprep.subr.bf16.mxu0 %v4965_v0  ;;  %v791_v15 = vand.u32 4294901760, %v735_v30  ;;  %5106 = vst [vmem:[#allocation10_spill] sm:$0xff] %v3937_v56  ;;  %3214 = vmatpush1.bf16.msra.mxu1 %v3937_v56 }
  0x6b   :  { %v3941_v20 = vpack.c.bf16 %v791_v15, %v787_v40  ;;  %v3946_v6 = vsub.f32 %v735_v30, %v791_v15  ;;  %v745_v15 = vld [vmem:[#allocation4 + $0x88] sm:$0xff] }
  0x6c   :  { %3105 = vmatpush3.bf16.msra.mxu0 %v3104_v46  ;;  %v3931_v46 = vsub.f32 %v729_v27, %v779_v9  ;;  %v795_v27 = vand.u32 4294901760, %v737_v43  ;;  %v797_v9 = vand.u32 4294901760, %v736_v49 }
  0x6d   :  { %3106 = vmatprep.subr.bf16.mxu0 %v4965_v0  ;;  %5107 = vst [vmem:[#allocation11_spill] sm:$0xff] %v3941_v20  ;;  %5108 = vst [vmem:[#allocation12_spill] sm:$0xff] %v3946_v6  ;;  %3216 = vmatprep.subr.bf16.mxu1 %v3941_v20  ;;  %v746_v20 = vld [vmem:[#allocation4 + $0x90] sm:$0xff] }
  0x6e   :  { %v3959_v33 = vpack.c.bf16 %v799_v7, %v795_v27  ;;  %v3965_v44 = vsub.f32 %v736_v49, %v797_v9 }
  0x70   :  { %3108 = vmatpush3.bf16.msra.mxu0 %v3107_v53  ;;  %v738_v53 = vld [vmem:[#allocation4 + $0x50] sm:$0xff] }
  0x71   :  { %3109 = vmatprep.subr.bf16.mxu0 %v4965_v0  ;;  %v801_v10 = vand.u32 4294901760, %v738_v53 }
  0x73   :  { %v3963_v56 = vpack.c.bf16 %v801_v10, %v797_v9  ;;  %v3967_v6 = vsub.f32 %v738_v53, %v801_v10  ;;  %v817_v53 = vand.u32 4294901760, %v746_v20 }
  0x74   :  { %3111 = vmatpush3.bf16.msra.mxu0 %v3110_v21  ;;  %v3943_v21 = vsub.f32 %v733_v11, %v787_v40  ;;  %v742_v11 = vld [vmem:[#allocation4 + $0x70] sm:$0xff]  ;;  %v3957_v40 = vsub.f32 %v737_v43, %v795_v27  ;;  %v805_v43 = vand.u32 4294901760, %v740_v25  ;;  %v811_v27 = vand.u32 4294901760, %v745_v15 }
  0x75   :  { %3112 = vmatprep.subr.bf16.mxu0 %v4965_v0  ;;  %5110 = vst [vmem:[#allocation14_spill] sm:$0xff] %v3963_v56  ;;  %5111 = vst [vmem:[#allocation15_spill] sm:$0xff] %v3967_v6 }
  0x76   :  { %v3982_v10 = vsub.f32 %v745_v15, %v811_v27  ;;  %v4985_v15 = vand.u32 4294901760, %v3933_v47 }
  0x78   :  { %3114 = vmatpush3.bf16.msra.mxu0 %v3113_v22  ;;  %v789_v22 = vand.u32 4294901760, %v732_v41 }
  0x79   :  { %3115 = vmatprep.subr.bf16.mxu0 %v4965_v0 }
  0x7a   :  { %v3953_v30 = vsub.f32 %v732_v41, %v789_v22  ;;  %v807_v41 = vand.u32 4294901760, %v743_v5 }
  0x7b   :  { %2925 = vmatmul.mubr.f32.vlgmr.msra.gmra.mrb[0].mxu0 %v3804_v31 }
  0x7c   :  { %3117 = vmatpush3.bf16.msra.mxu0 %v3116_v14  ;;  %2959 = vmatprep.mubr.msk.f32.mxu0 %vm3706_vm0, %v4963_v1  ;;  %v793_v14 = vand.u32 4294901760, %v734_v16  ;;  %v744_v1 = vld [vmem:[#allocation4 + $0x80] sm:$0xff]  ;;  %v3974_v49 = vpack.c.bf16 %v807_v41, %v803_v24  ;;  %v3976_v9 = vsub.f32 %v743_v5, %v807_v41  ;;  %v3993_v5 = vsub.f32 %v746_v20, %v817_v53 }
  0x7d   :  { %3118 = vmatprep.subr.bf16.mxu0 %v4965_v0  ;;  %v756_v20 = vld [vmem:[#allocation4 + $0xe0] sm:$0xff] }
  0x7e   :  { %v3955_v42 = vsub.f32 %v734_v16, %v793_v14  ;;  %v3969_v16 = vsub.f32 %v741_v57, %v803_v24  ;;  %5114 = vst [vmem:[#allocation17_spill] sm:$0xff] %v3974_v49 }
  0x80   :  { %3120 = vmatpush3.bf16.msra.mxu0 %v3119_v23  ;;  %v3951_v23 = vpack.c.bf16 %v793_v14, %v789_v22  ;;  %5112 = vst [vmem:[#allocation16_spill] sm:$0xff] %v3969_v16  ;;  %v5113_v22 = vmov 0.0|0.0   ;;  %v809_v14 = vand.u32 4294901760, %v742_v11  ;;  %v3128_v16 = vpack.c.bf16 %v3831_v54, %v3827_v52 }
  0x81   :  { %3121 = vmatprep.subr.bf16.mxu0 %v4965_v0  ;;  %v3961_v0 = vsub.f32 %v739_v17, %v799_v7  ;;  %v815_v17 = vand.u32 4294901760, %v747_v61  ;;  %v813_v7 = vand.u32 4294901760, %v744_v1  ;;  %v3137_v52 = vpack.c.bf16 %v3853_v4, %v3851_v3  ;;  %v752_v4 = vld [vmem:[#allocation4 + $0xc0] sm:$0xff] }
  0x82   :  { %5109 = vst [vmem:[#allocation13_spill] sm:$0xff] %v3951_v23  ;;  %3218 = vmatpush1.bf16.msra.mxu1 %v3951_v23  ;;  %v3980_v57 = vsub.f32 %v742_v11, %v809_v14  ;;  %v5115_v23 = vpack.c.bf16 %v3825_v51, %v3823_v50  ;;  %v3131_v50 = vpack.c.bf16 %v3840_v59, %v3838_v58  ;;  %v5119_v54 = vmov 0.0  }
  0x83   :  { %3220 = vmatprep.subr.bf16.mxu1 %v3959_v33  ;;  %v3989_v6 = vsub.f32 %v747_v61, %v815_v17  ;;  %v3991_v24 = vsub.f32 %v744_v1, %v813_v7  ;;  %v4000_v11 = vpack.c.bf16 %v815_v17, %v811_v27  ;;  %v4006_v1 = vpack.c.bf16 %v817_v53, %v813_v7 }
  0x84   :  { %3123 = vmatpush3.bf16.msra.mxu0 %v3122_v8  ;;  %v3978_v8 = vsub.f32 %v740_v25, %v805_v43  ;;  %v3997_v25 = vpack.c.bf16 %v809_v14, %v805_v43  ;;  %v3134_v51 = vpack.c.bf16 %v3847_v63, %v3842_v60  ;;  %v5120_v58 = vand.u32 4294901760, %v3821_v45  ;;  %v753_v63 = vld [vmem:[#allocation4 + $0xc8] sm:$0xff]  ;;  %v758_v14 = vld [vmem:[#allocation4 + $0xf0] sm:$0xff] }
  0x85   :  { %3124 = vmatprep.subr.bf16.mxu0 %v5113_v22  ;;  %5117 = vst [vmem:[#allocation19_spill] sm:$0xff] %v4000_v11  ;;  %5118 = vst [vmem:[#allocation20_spill] sm:$0xff] %v4006_v1  ;;  %v827_v3 = vand.u32 4294901760, %v753_v63 }
  0x86   :  { %3222 = vmatpush1.bf16.msra.mxu1 %v3963_v56  ;;  %5116 = vst [vmem:[#allocation18_spill] sm:$0xff] %v3997_v25 }
  0x87   :  { %3224 = vmatprep.subr.bf16.mxu1 %v3974_v49  ;;  %v4097_v27 = vsub.f32 %v753_v63, %v827_v3 }
  0x88   :  { %3126 = vmatpush3.bf16.msra.mxu0 %v5115_v23  ;;  %v4989_v23 = vand.u32 4294901760, %v3931_v46 }
  0x89   :  { %3127 = vmatprep.subr.bf16.mxu0 %v5113_v22 }
  0x8a   :  { %3226 = vmatpush1.bf16.msra.mxu1 %v3997_v25 }
  0x8b   :  { %3228 = vmatprep.subr.bf16.mxu1 %v4000_v11 }
  0x8c   :  { %3129 = vmatpush3.bf16.msra.mxu0 %v3128_v16 }
  0x8d   :  { %3130 = vmatprep.subr.bf16.mxu0 %v5113_v22 }
  0x8e   :  { %3230 = vmatpush1.bf16.msra.mxu1 %v4006_v1 }
  0x90   :  { %3132 = vmatpush3.bf16.msra.mxu0 %v3131_v50 }
  0x91   :  { %3133 = vmatprep.subr.bf16.mxu0 %v5113_v22 }
  0x94   :  { %3135 = vmatpush3.bf16.msra.mxu0 %v3134_v51 }
  0x95   :  { %3136 = vmatprep.subr.bf16.mxu0 %v5113_v22 }
  0x98   :  { %3138 = vmatpush3.bf16.msra.mxu0 %v3137_v52 }
  0x99   :  { %3139 = vmatprep.subr.bf16.mxu0 %v5113_v22 }
  0x9b   :  { %2960 = vmatmul.mubr.f32.vlgmr.msra.gmra.mrb[0].mxu0 %v3821_v45  ;;  %v748_v45 = vld [vmem:[#allocation4 + $0xa0] sm:$0xff] }
  0x9c   :  { %3141 = vmatpush3.bf16.msra.mxu0 %v3783_v12  ;;  %2994 = vmatprep.mubr.msk.f32.mxu0 %vm3706_vm0, %v5119_v54  ;;  %v821_v59 = vand.u32 4294901760, %v748_v45 }
  0x9d   :  { %3142 = vmatprep.subr.bf16.mxu0 %v5113_v22 }
  0x9e   :  { %v4092_v43 = vsub.f32 %v748_v45, %v821_v59 }
  0xa0   :  { %3144 = vmatpush3.bf16.msra.mxu0 %v3786_v13 }
  0xa1   :  { %3145 = vmatprep.subr.bf16.mxu0 %v5113_v22 }
  0xa4   :  { %3147 = vmatpush3.bf16.msra.mxu0 %v3790_v18 }
  0xa5   :  { %3148 = vmatprep.subr.bf16.mxu0 %v5113_v22 }
  0xa8   :  { %3150 = vmatpush3.bf16.msra.mxu0 %v3801_v26 }
  0xa9   :  { %3151 = vmatprep.subr.bf16.mxu0 %v5113_v22 }
  0xac   :  { %3153 = vmatpush3.bf16.msra.mxu0 %v3809_v38 }
  0xad   :  { %3154 = vmatprep.subr.bf16.mxu0 %v5113_v22 }
  0xb0   :  { %3156 = vmatpush3.bf16.msra.mxu0 %v3833_v55 }
  0xb1   :  { %3157 = vmatprep.subr.bf16.mxu0 %v5113_v22 }
  0xb4   :  { %3159 = vmatpush3.bf16.msra.mxu0 %v3845_v62 }
  0xb5   :  { %3160 = vmatprep.subr.bf16.mxu0 %v5113_v22 }
  0xb8   :  { %3162 = vmatpush3.bf16.msra.mxu0 %v3849_v2 }
  0xb9   :  { %3163 = vmatprep.subr.bf16.mxu0 %v5113_v22 }
  0xbb   :  { %2995 = vmatmul.mubr.f32.vlgmr.msra.gmra.mrb[0].mxu0 %v5120_v58  ;;  %v837_v58 = vand.u32 4294901760, %v756_v20 }
  0xbc   :  { %3165 = vmatpush3.bf16.msra.mxu0 %v3874_v28  ;;  %3029 = vmatprep.mubr.msk.f32.mxu0 %vm3706_vm0, %v5119_v54  ;;  %v829_v28 = vand.u32 4294901760, %v752_v4 }
  0xbd   :  { %3166 = vmatprep.subr.bf16.mxu0 %v5113_v22  ;;  %v4119_v45 = vsub.f32 %v756_v20, %v837_v58 }
  0xbe   :  { %v4101_v7 = vsub.f32 %v752_v4, %v829_v28 }
  0xbf   :  { %v5031_v1 = vand.u32 4294901760, %v4119_v45 }
  0xc0   :  { %3168 = vmatpush3.bf16.msra.mxu0 %v3876_v29 }
  0xc1   :  { %3169 = vmatprep.subr.bf16.mxu0 %v5113_v22 }
  0xc4   :  { %3171 = vmatpush3.bf16.msra.mxu0 %v3880_v32 }
  0xc5   :  { %3172 = vmatprep.subr.bf16.mxu0 %v5113_v22 }
  0xc8   :  { %3174 = vmatpush3.bf16.msra.mxu0 %v3882_v34 }
  0xc9   :  { %3175 = vmatprep.subr.bf16.mxu0 %v5113_v22 }
  0xcc   :  { %3177 = vmatpush3.bf16.msra.mxu0 %v3884_v35  ;;  %v757_v35 = vld [vmem:[#allocation4 + $0xe8] sm:$0xff] }
  0xcd   :  { %3178 = vmatprep.subr.bf16.mxu0 %v5113_v22 }
  0xd0   :  { %3180 = vmatpush3.bf16.msra.mxu0 %v3887_v36  ;;  %v759_v36 = vld [vmem:[#allocation4 + $0xf8] sm:$0xff] }
  0xd1   :  { %3181 = vmatprep.subr.bf16.mxu0 %v5113_v22 }
  0xd4   :  { %3183 = vmatpush3.bf16.msra.mxu0 %v3889_v37  ;;  %v835_v37 = vand.u32 4294901760, %v757_v35 }
  0xd5   :  { %3184 = vmatprep.subr.bf16.mxu0 %v5113_v22 }
  0xd6   :  { %v4107_v51 = vsub.f32 %v757_v35, %v835_v37 }
  0xd8   :  { %3186 = vmatpush3.bf16.msra.mxu0 %v3891_v39  ;;  %v839_v39 = vand.u32 4294901760, %v759_v36 }
  0xd9   :  { %3187 = vmatprep.subr.bf16.mxu0 %v5113_v22 }
  0xda   :  { %v4105_v50 = vpack.c.bf16 %v839_v39, %v835_v37  ;;  %v4109_v52 = vsub.f32 %v759_v36, %v839_v39  ;;  %v4980_v37 = vand.u32 4294901760, %v3953_v30  ;;  %v4981_v39 = vand.u32 4294901760, %v3955_v42 }
  0xdb   :  { %3030 = vmatmul.mubr.f32.vlgmr.msra.gmra.mrb[0].mxu0 %v3804_v31 }
  0xdc   :  { %3189 = vmatpush3.bf16.msra.mxu0 %v3783_v12  ;;  %3064 = vmatprep.mubr.msk.f32.mxu0 %vm3706_vm0, %v5119_v54  ;;  %v749_v12 = vld [vmem:[#allocation4 + $0xa8] sm:$0xff]  ;;  %5125 = vst [vmem:[#allocation25_spill] sm:$0xff] %v4105_v50 }
  0xdd   :  { %3190 = vmatprep.subr.bf16.mxu0 %v5113_v22 }
  0xe0   :  { %3192 = vmatpush3.bf16.msra.mxu0 %v3786_v13  ;;  %v751_v13 = vld [vmem:[#allocation4 + $0xb8] sm:$0xff] }
  0xe1   :  { %3193 = vmatprep.subr.bf16.mxu0 %v5113_v22 }
  0xe4   :  { %3195 = vmatpush3.bf16.msra.mxu0 %v3790_v18  ;;  %v819_v18 = vand.u32 4294901760, %v749_v12 }
  0xe5   :  { %3196 = vmatprep.subr.bf16.mxu0 %v5113_v22 }
  0xe6   :  { %v4088_v41 = vsub.f32 %v749_v12, %v819_v18  ;;  %v841_v12 = vand.u32 4294901760, %v758_v14 }
  0xe8   :  { %3198 = vmatpush3.bf16.msra.mxu0 %v3801_v26  ;;  %v823_v26 = vand.u32 4294901760, %v751_v13 }
  0xe9   :  { %3199 = vmatprep.subr.bf16.mxu0 %v5113_v22 }
  0xea   :  { %v4075_v61 = vpack.c.bf16 %v823_v26, %v819_v18  ;;  %v4090_v16 = vsub.f32 %v751_v13, %v823_v26  ;;  %v890_v13 = vsub.f32 %v3931_v46, %v4989_v23  ;;  %v902_v18 = vsub.f32 %v3933_v47, %v4985_v15 }
  0xeb   :  { %v4984_v26 = vand.u32 4294901760, %v3935_v48 }
  0xec   :  { %3201 = vmatpush3.bf16.msra.mxu0 %v3809_v38  ;;  %v750_v38 = vld [vmem:[#allocation4 + $0xb0] sm:$0xff]  ;;  %5121 = vst [vmem:[#allocation21_spill] sm:$0xff] %v4075_v61  ;;  %3232 = vmatprep.subr.bf16.mxu1 %v4075_v61  ;;  %v903_v4 = vand.u32 4294901760, %v902_v18  ;;  %v932_v18 = vsub.f32 %v3955_v42, %v4981_v39 }
  0xed   :  { %3202 = vmatprep.subr.bf16.mxu0 %v5113_v22  ;;  %v825_v60 = vand.u32 4294901760, %v750_v38 }
  0xf0   :  { %3204 = vmatpush3.bf16.msra.mxu0 %v3833_v55  ;;  %v4077_v55 = vpack.c.bf16 %v825_v60, %v821_v59  ;;  %v4979_v59 = vand.u32 4294901760, %v3943_v21 }
  0xf1   :  { %3205 = vmatprep.subr.bf16.mxu0 %v5113_v22 }
  0xf2   :  { %5122 = vst [vmem:[#allocation22_spill] sm:$0xff] %v4077_v55  ;;  %3234 = vmatpush1.bf16.msra.mxu1 %v4077_v55  ;;  %v5013_v55 = vand.u32 4294901760, %v4097_v27 }
  0xf4   :  { %3207 = vmatpush3.bf16.msra.mxu0 %v3845_v62  ;;  %v755_v62 = vld [vmem:[#allocation4 + $0xd8] sm:$0xff] }
  0xf5   :  { %3208 = vmatprep.subr.bf16.mxu0 %v5113_v22  ;;  %v4094_v22 = vsub.f32 %v750_v38, %v825_v60  ;;  %v4982_v38 = vand.u32 4294901760, %v3939_v19  ;;  %v5126_v60 = vld [vmem:[#allocation12_spill] sm:$0xff] }
  0xf6   :  { %v4978_v63 = vand.u32 4294901760, %v5126_v60 }
  0xf8   :  { %3210 = vmatpush3.bf16.msra.mxu0 %v3849_v2  ;;  %v831_v2 = vand.u32 4294901760, %v755_v62  ;;  %v926_v35 = vsub.f32 %v5126_v60, %v4978_v63  ;;  %v4983_v63 = vand.u32 4294901760, %v3957_v40 }
  0xfa   :  { %v4081_v32 = vpack.c.bf16 %v831_v2, %v827_v3  ;;  %v4099_v17 = vsub.f32 %v755_v62, %v831_v2  ;;  %v4124_v62 = vpack.c.bf16 %v841_v12, %v837_v58  ;;  %v4126_v3 = vsub.f32 %v758_v14, %v841_v12 }
  0xfb   :  { %3065 = vmatmul.mubr.f32.vlgmr.msra.gmra.mrb[0].mxu0 %v3804_v31  ;;  %v754_v31 = vld [vmem:[#allocation4 + $0xd0] sm:$0xff]  ;;  %v891_v2 = vand.u32 4294901760, %v890_v13  ;;  %v927_v12 = vand.u32 4294901760, %v926_v35  ;;  %v920_v13 = vsub.f32 %v3953_v30, %v4980_v37  ;;  %v938_v37 = vsub.f32 %v3957_v40, %v4983_v63 }
  0xfc   :  { %v833_v29 = vand.u32 4294901760, %v754_v31  ;;  %5123 = vst [vmem:[#allocation23_spill] sm:$0xff] %v4081_v32  ;;  %3236 = vmatprep.subr.bf16.mxu1 %v4081_v32  ;;  %5127 = vst [vmem:[#allocation12_spill] sm:$0xff] %v4124_v62 }
  0xfd   :  { %v3243_v36 = vpack.c.bf16 %v903_v4, %v891_v2  ;;  %v4986_v2 = vand.u32 4294901760, %v3961_v0  ;;  %v921_v35 = vand.u32 4294901760, %v920_v13  ;;  %v4993_v13 = vand.u32 4294901760, %v3976_v9 }
  0xfe   :  { %v4083_v34 = vpack.c.bf16 %v833_v29, %v829_v28  ;;  %v4103_v53 = vsub.f32 %v754_v31, %v833_v29  ;;  %v896_v31 = vsub.f32 %v3935_v48, %v4984_v26  ;;  %v908_v28 = vsub.f32 %v3939_v19, %v4982_v38 }
  0xff   :  { %v914_v29 = vsub.f32 %v3943_v21, %v4979_v59  ;;  %v950_v39 = vsub.f32 %v3961_v0, %v4986_v2  ;;  %v939_v38 = vand.u32 4294901760, %v938_v37  ;;  %v4996_v26 = vand.u32 4294901760, %v3978_v8 }
 0x100   :  { %5124 = vst [vmem:[#allocation24_spill] sm:$0xff] %v4083_v34  ;;  %3238 = vmatpush1.bf16.msra.mxu1 %v4083_v34  ;;  %v897_v20 = vand.u32 4294901760, %v896_v31  ;;  %v909_v14 = vand.u32 4294901760, %v908_v28  ;;  %v4987_v31 = vand.u32 4294901760, %v3965_v44  ;;  %v5128_v28 = vld [vmem:[#allocation15_spill] sm:$0xff]  ;;  %v4994_v37 = vand.u32 4294901760, %v3980_v57 }
 0x101   :  { %3240 = vmatprep.subr.bf16.mxu1 %v4105_v50  ;;  %v915_v58 = vand.u32 4294901760, %v914_v29  ;;  %v4988_v29 = vand.u32 4294901760, %v5128_v28  ;;  %v951_v63 = vand.u32 4294901760, %v950_v39  ;;  %v5012_v34 = vand.u32 4294901760, %v4092_v43 }
 0x102   :  { %v4151_v4 = vpack.c.bf16 %v909_v14, %v897_v20  ;;  %v944_v20 = vsub.f32 %v3965_v44, %v4987_v31 }
 0x103   :  { %v4153_v59 = vpack.c.bf16 %v927_v12, %v915_v58  ;;  %v956_v14 = vsub.f32 %v5128_v28, %v4988_v29  ;;  %v5129_v58 = vld [vmem:[#allocation16_spill] sm:$0xff]  ;;  %v974_v29 = vsub.f32 %v3976_v9, %v4993_v13  ;;  %v4180_v23 = vpack.c.bf16 %v951_v63, %v939_v38 }
 0x104   :  { %3242 = vmatpush1.bf16.msra.mxu1 %v4124_v62  ;;  %v4992_v12 = vand.u32 4294901760, %v5129_v58  ;;  %v945_v15 = vand.u32 4294901760, %v944_v20  ;;  %v5001_v38 = vand.u32 4294901760, %v3989_v6  ;;  %v5002_v63 = vand.u32 4294901760, %v3991_v24 }
 0x105   :  { %3244 = vmatprep.subr.bf16.mxu1 %v3243_v36  ;;  %v933_v36 = vand.u32 4294901760, %v932_v18  ;;  %v957_v2 = vand.u32 4294901760, %v956_v14  ;;  %v975_v20 = vand.u32 4294901760, %v974_v29  ;;  %v4995_v14 = vand.u32 4294901760, %v3982_v10 }
 0x106   :  { %v962_v31 = vsub.f32 %v5129_v58, %v4992_v12  ;;  %v980_v12 = vsub.f32 %v3980_v57, %v4994_v37  ;;  %v998_v29 = vsub.f32 %v3989_v6, %v5001_v38 }
 0x107   :  { %v4171_v18 = vpack.c.bf16 %v933_v36, %v921_v35  ;;  %v968_v35 = vsub.f32 %v3978_v8, %v4996_v26  ;;  %v4186_v39 = vpack.c.bf16 %v957_v2, %v945_v15  ;;  %v986_v15 = vsub.f32 %v3982_v10, %v4995_v14 }
 0x108   :  { %v963_v36 = vand.u32 4294901760, %v962_v31  ;;  %v5003_v2 = vand.u32 4294901760, %v3993_v5  ;;  %v981_v31 = vand.u32 4294901760, %v980_v12  ;;  %v5009_v14 = vand.u32 4294901760, %v4090_v16 }
 0x109   :  { %v969_v62 = vand.u32 4294901760, %v968_v35  ;;  %v992_v35 = vsub.f32 %v3991_v24, %v5002_v63  ;;  %v987_v37 = vand.u32 4294901760, %v986_v15  ;;  %v999_v12 = vand.u32 4294901760, %v998_v29 }
 0x10a   :  { %v4194_v13 = vpack.c.bf16 %v975_v20, %v963_v36  ;;  %v1004_v36 = vsub.f32 %v3993_v5, %v5003_v2  ;;  %v5006_v20 = vand.u32 4294901760, %v4088_v41  ;;  %v1022_v15 = vsub.f32 %v4090_v16, %v5009_v14 }
 0x10b   :  { %v4211_v26 = vpack.c.bf16 %v981_v31, %v969_v62  ;;  %v993_v50 = vand.u32 4294901760, %v992_v35  ;;  %v5014_v2 = vand.u32 4294901760, %v4094_v22  ;;  %v4221_v32 = vpack.c.bf16 %v999_v12, %v987_v37 }
 0x10c   :  { %v1005_v38 = vand.u32 4294901760, %v1004_v36  ;;  %v1010_v63 = vsub.f32 %v4088_v41, %v5006_v20  ;;  %v1016_v62 = vsub.f32 %v4092_v43, %v5012_v34  ;;  %v1023_v35 = vand.u32 4294901760, %v1022_v15 }
 0x10d   :  { %v1028_v36 = vsub.f32 %v4094_v22, %v5014_v2  ;;  %v5017_v14 = vand.u32 4294901760, %v4099_v17  ;;  %v5018_v37 = vand.u32 4294901760, %v4101_v7  ;;  %v5019_v34 = vand.u32 4294901760, %v4103_v53 }
 0x10e   :  { %v4226_v31 = vpack.c.bf16 %v1005_v38, %v993_v50  ;;  %v1011_v29 = vand.u32 4294901760, %v1010_v63  ;;  %v1017_v20 = vand.u32 4294901760, %v1016_v62  ;;  %v1034_v50 = vsub.f32 %v4097_v27, %v5013_v55 }
 0x10f   :  { %v1029_v61 = vand.u32 4294901760, %v1028_v36  ;;  %v1046_v38 = vsub.f32 %v4099_v17, %v5017_v14  ;;  %v1040_v63 = vsub.f32 %v4101_v7, %v5018_v37  ;;  %v1052_v62 = vsub.f32 %v4103_v53, %v5019_v34 }
 0x110   :  { %v4234_v12 = vpack.c.bf16 %v1023_v35, %v1011_v29  ;;  %v5024_v29 = vand.u32 4294901760, %v4107_v51  ;;  %v5029_v35 = vand.u32 4294901760, %v4109_v52  ;;  %v1035_v36 = vand.u32 4294901760, %v1034_v50 }
 0x111   :  { %v4246_v15 = vpack.c.bf16 %v1029_v61, %v1017_v20  ;;  %v1047_v55 = vand.u32 4294901760, %v1046_v38  ;;  %v1041_v2 = vand.u32 4294901760, %v1040_v63  ;;  %v1053_v14 = vand.u32 4294901760, %v1052_v62 }
 0x112   :  { %v1058_v37 = vsub.f32 %v4107_v51, %v5024_v29  ;;  %v1070_v61 = vsub.f32 %v4109_v52, %v5029_v35  ;;  %v5030_v20 = vand.u32 4294901760, %v4126_v3  ;;  %v1064_v50 = vsub.f32 %v4119_v45, %v5031_v1 }
 0x113   :  { %v3267_v34 = vpack.c.bf16 %v1047_v55, %v1035_v36  ;;  %v3269_v38 = vpack.c.bf16 %v1053_v14, %v1041_v2  ;;  %v3275_v35 = vpack.c.bf16 %v3933_v47, %v3931_v46  ;;  %v3277_v55 = vpack.c.bf16 %v3939_v19, %v3935_v48 }
 0x114   :  { %v1059_v63 = vand.u32 4294901760, %v1058_v37  ;;  %v1071_v11 = vand.u32 4294901760, %v1070_v61  ;;  %v1076_v62 = vsub.f32 %v4126_v3, %v5030_v20  ;;  %v1065_v25 = vand.u32 4294901760, %v1064_v50 }
 0x115   :  { %v3279_v36 = vpack.c.bf16 %v5126_v60, %v3943_v21 }
 0x116   :  { %v3271_v29 = vpack.c.bf16 %v1071_v11, %v1059_v63  ;;  %v1077_v49 = vand.u32 4294901760, %v1076_v62  ;;  %v4305_v63 = vld [vmem:[%s4959_s4] sm:$0x77] }
 0x117   :  { %5131 = vst [vmem:[#allocation16_spill] sm:$0xff] %v4305_v63 }
 0x118   :  { %v3273_v56 = vpack.c.bf16 %v1077_v49, %v1065_v25  ;;  %v81_v25 = vlaneseq }
 0x11a   :  { %v4299_v61 = vshrl.u32 %v81_v25, 7 }
 0x11c   :  { %5130 = vst [vmem:[#allocation15_spill] sm:$0xff] %v4299_v61  ;;  %v83_v50 = vsub.s32 0, %v4299_v61 }
 0x11e   :  { %v84_v62 = vrot.slane %v4305_v63, %v83_v50  ;;  %v1658_v63 = vld [vmem:[#allocation6 + $0xb0] sm:$0xff] }
 0x1ce   :  { %v722_v49 = vpop.f32.mrb[0].mxu0 }
 0x1cf   :  { %v3595_v20 = vadd.f32 %v722_v49, %v84_v62  ;;  %v3066_v11 = vpop.f32.mrb[1].mxu0 }
 0x1d1   :  { %v726_v2 = vmax.f32 %v3595_v20, 0.0 }
 0x1d3   :  { %727 = vst [vmem:[%s4961_s6] sm:$0xff] %v726_v2  ;;  %v4311_v37 = vand.u32 4294901760, %v726_v2 }
 0x1d5   :  { %v4314_v25 = vsub.f32 %v726_v2, %v4311_v37 }
 0x1d7   :  { %v5032_v1 = vand.u32 4294901760, %v4314_v25 }
 0x1d9   :  { %v879_v14 = vsub.f32 %v4314_v25, %v5032_v1 }
 0x1db   :  { %v880_v50 = vand.u32 4294901760, %v879_v14 }
 0x1dd   :  { %881 = vmatmul.mubr.f32.vlgmr.msra.gmra.mrb[0].mxu1 %v880_v50  ;;  %v5137_v50 = vpack.c.bf16 %v3961_v0, %v3957_v40 }
 0x1de   :  { %3246 = vmatpush1.bf16.msra.mxu1 %v4151_v4  ;;  %1111 = vmatprep.mubr.f32.mxu1 %v5119_v54  ;;  %v1636_v4 = vld [vmem:[#allocation6] sm:$0xff] }
 0x1df   :  { %3248 = vmatprep.subr.bf16.mxu1 %v4153_v59  ;;  %v1653_v59 = vld [vmem:[#allocation6 + $0x88] sm:$0xff] }
 0x1e2   :  { %3250 = vmatpush1.bf16.msra.mxu1 %v4171_v18  ;;  %v1673_v18 = vand.u32 4294901760, %v1636_v4 }
 0x1e3   :  { %3252 = vmatprep.subr.bf16.mxu1 %v4180_v23  ;;  %v1652_v23 = vld [vmem:[#allocation6 + $0x80] sm:$0xff] }
 0x1e6   :  { %3254 = vmatpush1.bf16.msra.mxu1 %v4186_v39  ;;  %v1654_v39 = vld [vmem:[#allocation6 + $0x90] sm:$0xff] }
 0x1e7   :  { %3256 = vmatprep.subr.bf16.mxu1 %v4194_v13  ;;  %v1637_v13 = vld [vmem:[#allocation6 + $0x8] sm:$0xff] }
 0x1ea   :  { %3258 = vmatpush1.bf16.msra.mxu1 %v4211_v26  ;;  %v1724_v26 = vand.u32 4294901760, %v1653_v59 }
 0x1eb   :  { %3260 = vmatprep.subr.bf16.mxu1 %v4221_v32  ;;  %v1721_v32 = vand.u32 4294901760, %v1652_v23 }
 0x1ec   :  { %v4336_v20 = vsub.f32 %v1653_v59, %v1724_v26  ;;  %v1656_v59 = vld [vmem:[#allocation6 + $0xa0] sm:$0xff] }
 0x1ed   :  { %v1733_v1 = vand.u32 4294901760, %v1656_v59 }
 0x1ee   :  { %3262 = vmatpush1.bf16.msra.mxu1 %v4226_v31  ;;  %v1655_v31 = vld [vmem:[#allocation6 + $0x98] sm:$0xff] }
 0x1ef   :  { %3264 = vmatprep.subr.bf16.mxu1 %v4234_v12  ;;  %v1727_v12 = vand.u32 4294901760, %v1654_v39 }
 0x1f1   :  { %v4342_v2 = vsub.f32 %v1654_v39, %v1727_v12  ;;  %v5140_v39 = vpack.c.bf16 %v3976_v9, %v5129_v58 }
 0x1f2   :  { %3266 = vmatpush1.bf16.msra.mxu1 %v4246_v15  ;;  %v1730_v15 = vand.u32 4294901760, %v1655_v31 }
 0x1f3   :  { %3268 = vmatprep.subr.bf16.mxu1 %v3267_v34  ;;  %v1676_v34 = vand.u32 4294901760, %v1637_v13  ;;  %5133 = vst [vmem:[#allocation27_spill] sm:$0xff] %v4342_v2 }
 0x1f4   :  { %v4344_v11 = vsub.f32 %v1655_v31, %v1730_v15  ;;  %v1640_v31 = vld [vmem:[#allocation6 + $0x20] sm:$0xff]  ;;  %v4377_v2 = vpack.c.bf16 %v1730_v15, %v1727_v12  ;;  %v5150_v12 = vpack.c.bf16 %v3993_v5, %v3991_v24 }
 0x1f5   :  { %v4340_v14 = vsub.f32 %v1637_v13, %v1676_v34  ;;  %v1657_v13 = vld [vmem:[#allocation6 + $0xa8] sm:$0xff] }
 0x1f6   :  { %3270 = vmatpush1.bf16.msra.mxu1 %v3269_v38  ;;  %v4338_v38 = vsub.f32 %v1636_v4, %v1673_v18  ;;  %5134 = vst [vmem:[#allocation28_spill] sm:$0xff] %v4344_v11  ;;  %v5139_v4 = vpack.c.bf16 %v5128_v28, %v3965_v44  ;;  %v1736_v61 = vand.u32 4294901760, %v1657_v13  ;;  %v1642_v11 = vld [vmem:[#allocation6 + $0x30] sm:$0xff]  ;;  %5146 = vst [vmem:[#allocation34_spill] sm:$0xff] %v4377_v2 }
 0x1f7   :  { %3272 = vmatprep.subr.bf16.mxu1 %v3271_v29  ;;  %v1639_v29 = vld [vmem:[#allocation6 + $0x18] sm:$0xff]  ;;  %5132 = vst [vmem:[#allocation26_spill] sm:$0xff] %v4340_v14  ;;  %v1739_v14 = vand.u32 4294901760, %v1658_v63 }
 0x1f8   :  { %v1682_v49 = vand.u32 4294901760, %v1639_v29 }
 0x1fa   :  { %3274 = vmatpush1.bf16.msra.mxu1 %v3273_v56  ;;  %v1638_v56 = vld [vmem:[#allocation6 + $0x10] sm:$0xff] }
 0x1fb   :  { %3276 = vmatprep.subr.bf16.mxu1 %v3275_v35  ;;  %v4334_v35 = vsub.f32 %v1652_v23, %v1721_v32  ;;  %v4354_v23 = vsub.f32 %v1639_v29, %v1682_v49  ;;  %v5142_v29 = vpack.c.bf16 %v3980_v57, %v3978_v8 }
 0x1fd   :  { %1113 = vmatmul.mubr.f32.vlgmr.msra.gmra.mrb[0].mxu1 %v4311_v37  ;;  %5138 = vst [vmem:[#allocation30_spill] sm:$0xff] %v4354_v23  ;;  %v4370_v23 = vpack.c.bf16 %v1676_v34, %v1673_v18  ;;  %v1643_v34 = vld [vmem:[#allocation6 + $0x38] sm:$0xff] }
 0x1fe   :  { %3278 = vmatpush1.bf16.msra.mxu1 %v3277_v55  ;;  %1247 = vmatprep.mubr.f32.mxu1 %v5119_v54  ;;  %v1679_v55 = vand.u32 4294901760, %v1638_v56 }
 0x1ff   :  { %3280 = vmatprep.subr.bf16.mxu1 %v3279_v36  ;;  %v5135_v36 = vpack.c.bf16 %v3955_v42, %v3953_v30  ;;  %5144 = vst [vmem:[#allocation33_spill] sm:$0xff] %v4370_v23 }
 0x200   :  { %v4349_v62 = vsub.f32 %v1638_v56, %v1679_v55  ;;  %v4362_v56 = vpack.c.bf16 %v1724_v26, %v1721_v32  ;;  %v5145_v32 = vpack.c.bf16 %v3989_v6, %v3982_v10  ;;  %v4375_v26 = vsub.f32 %v1657_v13, %v1736_v61 }
 0x201   :  { %v5152_v13 = vpack.c.bf16 %v4090_v16, %v4088_v41 }
 0x202   :  { %3282 = vmatpush1.bf16.msra.mxu1 %v5135_v36  ;;  %5136 = vst [vmem:[#allocation29_spill] sm:$0xff] %v4349_v62  ;;  %v1641_v36 = vld [vmem:[#allocation6 + $0x28] sm:$0xff]  ;;  %5141 = vst [vmem:[#allocation31_spill] sm:$0xff] %v4362_v56  ;;  %3404 = vmatprep.subr.bf16.mxu0 %v4362_v56  ;;  %v1685_v62 = vand.u32 4294901760, %v1640_v31  ;;  %v4385_v56 = vsub.f32 %v1658_v63, %v1739_v14 }
 0x203   :  { %3284 = vmatprep.subr.bf16.mxu1 %v5137_v50  ;;  %v1659_v50 = vld [vmem:[#allocation6 + $0xb8] sm:$0xff]  ;;  %3406 = vmatpush3.bf16.msra.mxu0 %v4370_v23 }
 0x204   :  { %v1742_v18 = vand.u32 4294901760, %v1659_v50  ;;  %3408 = vmatprep.subr.bf16.mxu0 %v4377_v2  ;;  %5148 = vst [vmem:[#allocation36_spill] sm:$0xff] %v4385_v56  ;;  %v5180_v23 = vld [vmem:[#allocation12_spill] sm:$0xff]  ;;  %v5183_v56 = vand.u32 4294901760, %v3943_v21 }
 0x206   :  { %3286 = vmatpush1.bf16.msra.mxu1 %v5139_v4  ;;  %v4368_v4 = vsub.f32 %v1656_v59, %v1733_v1  ;;  %v4392_v15 = vsub.f32 %v1659_v50, %v1742_v18  ;;  %v5157_v50 = vpack.c.bf16 %v4099_v17, %v4097_v27 }
 0x207   :  { %3288 = vmatprep.subr.bf16.mxu1 %v5140_v39  ;;  %v1688_v39 = vand.u32 4294901760, %v1641_v36 }
 0x208   :  { %5143 = vst [vmem:[#allocation32_spill] sm:$0xff] %v4368_v4  ;;  %v4387_v4 = vpack.c.bf16 %v1682_v49, %v1679_v55  ;;  %5151 = vst [vmem:[#allocation38_spill] sm:$0xff] %v4392_v15  ;;  %v5155_v55 = vpack.c.bf16 %v4094_v22, %v4092_v43  ;;  %v4405_v49 = vpack.c.bf16 %v1736_v61, %v1733_v1 }
 0x209   :  { %v4382_v59 = vsub.f32 %v1641_v36, %v1688_v39  ;;  %v4420_v1 = vpack.c.bf16 %v1742_v18, %v1739_v14  ;;  %v5166_v14 = vld [vmem:[#allocation11_spill] sm:$0xff]  ;;  %v5167_v18 = vld [vmem:[#allocation13_spill] sm:$0xff] }
 0x20a   :  { %3290 = vmatpush1.bf16.msra.mxu1 %v5142_v29  ;;  %v4380_v29 = vsub.f32 %v1640_v31, %v1685_v62  ;;  %5149 = vst [vmem:[#allocation37_spill] sm:$0xff] %v4387_v4  ;;  %v1694_v31 = vand.u32 4294901760, %v1643_v34  ;;  %3410 = vmatpush3.bf16.msra.mxu0 %v4387_v4  ;;  %5156 = vst [vmem:[#allocation41_spill] sm:$0xff] %v4405_v49  ;;  %v5179_v4 = vand.u32 4294901760, %v3933_v47  ;;  %v5187_v47 = vand.u32 4294901760, %v3955_v42 }
 0x20b   :  { %3292 = vmatprep.subr.bf16.mxu1 %v5145_v32  ;;  %5147 = vst [vmem:[#allocation35_spill] sm:$0xff] %v4382_v59  ;;  %v1691_v32 = vand.u32 4294901760, %v1642_v11  ;;  %3412 = vmatprep.subr.bf16.mxu0 %v4405_v49  ;;  %5161 = vst [vmem:[#allocation43_spill] sm:$0xff] %v4420_v1  ;;  %v5178_v49 = vand.u32 4294901760, %v3931_v46  ;;  %v5184_v59 = vand.u32 4294901760, %v5126_v60  ;;  %v5186_v46 = vand.u32 4294901760, %v3953_v30 }
 0x20c   :  { %v4400_v63 = vsub.f32 %v1643_v34, %v1694_v31  ;;  %v5160_v34 = vpack.c.bf16 %v4109_v52, %v4107_v51  ;;  %v5190_v60 = vand.u32 4294901760, %v3965_v44  ;;  %v5192_v30 = vand.u32 4294901760, %v5129_v58 }
 0x20d   :  { %v4397_v36 = vsub.f32 %v1642_v11, %v1691_v32  ;;  %v5159_v11 = vpack.c.bf16 %v4103_v53, %v4101_v7  ;;  %v4423_v61 = vpack.c.bf16 %v1694_v31, %v1691_v32  ;;  %v5168_v32 = vld [vmem:[#allocation14_spill] sm:$0xff]  ;;  %v5169_v31 = vld [vmem:[#allocation17_spill] sm:$0xff]  ;;  %v3339_v2 = vpack.c.bf16 %v5179_v4, %v5178_v49 }
 0x20e   :  { %3294 = vmatpush1.bf16.msra.mxu1 %v5150_v12  ;;  %5154 = vst [vmem:[#allocation40_spill] sm:$0xff] %v4400_v63  ;;  %v4411_v12 = vpack.c.bf16 %v1688_v39, %v1685_v62  ;;  %v5163_v62 = vpack.c.bf16 %v4126_v3, %v4119_v45  ;;  %v5164_v39 = vld [vmem:[#allocation9_spill] sm:$0xff]  ;;  %v5181_v63 = vand.u32 4294901760, %v3935_v48  ;;  %v3345_v4 = vpack.c.bf16 %v5187_v47, %v5186_v46 }
 0x20f   :  { %3296 = vmatprep.subr.bf16.mxu1 %v5152_v13  ;;  %5153 = vst [vmem:[#allocation39_spill] sm:$0xff] %v4397_v36  ;;  %5162 = vst [vmem:[#allocation44_spill] sm:$0xff] %v4423_v61  ;;  %v5165_v13 = vld [vmem:[#allocation10_spill] sm:$0xff]  ;;  %v5182_v36 = vand.u32 4294901760, %v3939_v19  ;;  %v5188_v48 = vand.u32 4294901760, %v3957_v40  ;;  %v5189_v19 = vand.u32 4294901760, %v3961_v0 }
 0x210   :  { %5158 = vst [vmem:[#allocation42_spill] sm:$0xff] %v4411_v12  ;;  %3414 = vmatpush3.bf16.msra.mxu0 %v4411_v12  ;;  %v5177_v12 = vld [vmem:[#allocation25_spill] sm:$0xff]  ;;  %v5193_v42 = vand.u32 4294901760, %v3976_v9  ;;  %v5195_v40 = vand.u32 4294901760, %v3980_v57  ;;  %v5196_v0 = vand.u32 4294901760, %v3982_v10  ;;  %v5197_v44 = vand.u32 4294901760, %v3989_v6 }
 0x211   :  { %3416 = vmatprep.subr.bf16.mxu0 %v4420_v1  ;;  %v5176_v1 = vld [vmem:[#allocation24_spill] sm:$0xff]  ;;  %v3341_v15 = vpack.c.bf16 %v5182_v36, %v5181_v63  ;;  %v3347_v21 = vpack.c.bf16 %v5189_v19, %v5188_v48  ;;  %v5199_v58 = vand.u32 4294901760, %v3993_v5  ;;  %v5200_v9 = vand.u32 4294901760, %v4088_v41  ;;  %v5216_v48 = vld [vmem:[#allocation30_spill] sm:$0xff] }
 0x212   :  { %3298 = vmatpush1.bf16.msra.mxu1 %v5155_v55  ;;  %v5170_v55 = vld [vmem:[#allocation18_spill] sm:$0xff]  ;;  %v3355_v36 = vpack.c.bf16 %v5197_v44, %v5196_v0  ;;  %v5202_v57 = vand.u32 4294901760, %v4092_v43  ;;  %v5203_v10 = vand.u32 4294901760, %v4094_v22  ;;  %v5204_v6 = vand.u32 4294901760, %v4097_v27 }
 0x213   :  { %3300 = vmatprep.subr.bf16.mxu1 %v5157_v50  ;;  %v5171_v50 = vld [vmem:[#allocation19_spill] sm:$0xff]  ;;  %v5206_v5 = vand.u32 4294901760, %v4101_v7  ;;  %v5207_v41 = vand.u32 4294901760, %v4103_v53  ;;  %v5209_v43 = vand.u32 4294901760, %v4109_v52  ;;  %v5210_v22 = vand.u32 4294901760, %v4119_v45 }
 0x214   :  { %3418 = vmatpush3.bf16.msra.mxu0 %v4423_v61  ;;  %v5175_v61 = vld [vmem:[#allocation23_spill] sm:$0xff]  ;;  %v5211_v27 = vand.u32 4294901760, %v4126_v3  ;;  %v5080_v7 = vand.u32 4294901760, %v4336_v20  ;;  %v5075_v53 = vand.u32 4294901760, %v4338_v38  ;;  %v5214_v3 = vld [vmem:[#allocation28_spill] sm:$0xff]  ;;  %v5070_v19 = vand.u32 4294901760, %v5216_v48 }
 0x215   :  { %v3365_v46 = vpack.c.bf16 %v5207_v41, %v5206_v5  ;;  %v5220_v5 = vld [vmem:[#allocation38_spill] sm:$0xff] }
 0x216   :  { %3302 = vmatpush1.bf16.msra.mxu1 %v5159_v11  ;;  %v5172_v11 = vld [vmem:[#allocation20_spill] sm:$0xff]  ;;  %v1809_v0 = vsub.f32 %v5216_v48, %v5070_v19  ;;  %v5064_v41 = vand.u32 4294901760, %v5220_v5 }
 0x217   :  { %3304 = vmatprep.subr.bf16.mxu1 %v5160_v34  ;;  %v5173_v34 = vld [vmem:[#allocation21_spill] sm:$0xff] }
 0x21a   :  { %3306 = vmatpush1.bf16.msra.mxu1 %v5163_v62  ;;  %v5174_v62 = vld [vmem:[#allocation22_spill] sm:$0xff] }
 0x21b   :  { %3308 = vmatprep.subr.bf16.mxu1 %v5164_v39 }
 0x21d   :  { %1250 = vmatmul.mubr.f32.vlgmr.msra.gmra.mrb[0].mxu1 %v4314_v25 }
 0x21e   :  { %3310 = vmatpush1.bf16.msra.mxu1 %v5165_v13  ;;  %1352 = vmatprep.mubr.f32.mxu1 %v5119_v54 }
 0x21f   :  { %3312 = vmatprep.subr.bf16.mxu1 %v5166_v14 }
 0x222   :  { %3314 = vmatpush1.bf16.msra.mxu1 %v5167_v18 }
 0x223   :  { %3316 = vmatprep.subr.bf16.mxu1 %v3959_v33 }
 0x226   :  { %3318 = vmatpush1.bf16.msra.mxu1 %v5168_v32 }
 0x227   :  { %3320 = vmatprep.subr.bf16.mxu1 %v5169_v31 }
 0x22a   :  { %3322 = vmatpush1.bf16.msra.mxu1 %v5170_v55 }
 0x22b   :  { %3324 = vmatprep.subr.bf16.mxu1 %v5171_v50 }
 0x22e   :  { %3326 = vmatpush1.bf16.msra.mxu1 %v5172_v11 }
 0x22f   :  { %3328 = vmatprep.subr.bf16.mxu1 %v5173_v34 }
 0x232   :  { %3330 = vmatpush1.bf16.msra.mxu1 %v5174_v62 }
 0x233   :  { %3332 = vmatprep.subr.bf16.mxu1 %v5175_v61 }
 0x236   :  { %3334 = vmatpush1.bf16.msra.mxu1 %v5176_v1  ;;  %v3343_v1 = vpack.c.bf16 %v5184_v59, %v5183_v56  ;;  %v3351_v56 = vpack.c.bf16 %v5193_v42, %v5192_v30  ;;  %v5194_v59 = vand.u32 4294901760, %v3978_v8  ;;  %v5201_v8 = vand.u32 4294901760, %v4090_v16  ;;  %v4555_v42 = vld [vmem:[#allocation6 + $0xc0] sm:$0xff] }
 0x237   :  { %3336 = vmatprep.subr.bf16.mxu1 %v5177_v12  ;;  %v5185_v12 = vand.u32 4294901760, %v4314_v25  ;;  %v5191_v25 = vand.u32 4294901760, %v5128_v28  ;;  %v5198_v28 = vand.u32 4294901760, %v3991_v24  ;;  %v5205_v24 = vand.u32 4294901760, %v4099_v17 }
 0x238   :  { %v3359_v49 = vpack.c.bf16 %v5201_v8, %v5200_v9  ;;  %v5208_v16 = vand.u32 4294901760, %v4107_v51  ;;  %v5081_v17 = vand.u32 4294901760, %v4334_v35  ;;  %v5212_v51 = vld [vmem:[#allocation26_spill] sm:$0xff]  ;;  %v5068_v30 = vand.u32 4294901760, %v4375_v26 }
 0x239   :  { %v3357_v63 = vpack.c.bf16 %v5199_v58, %v5198_v28  ;;  %v5074_v52 = vand.u32 4294901760, %v5212_v51  ;;  %v4569_v58 = vld [vmem:[#allocation6 + $0x40] sm:$0xff]  ;;  %v5067_v8 = vand.u32 4294901760, %v4380_v29 }
 0x23a   :  { %3338 = vmatpush1.bf16.msra.mxu1 %v5180_v23  ;;  %v3367_v47 = vpack.c.bf16 %v5209_v43, %v5208_v16  ;;  %v1935_v9 = vsub.f32 %v4375_v26, %v5068_v30  ;;  %v1810_v43 = vand.u32 4294901760, %v1809_v0  ;;  %v5224_v0 = vld [vmem:[#allocation40_spill] sm:$0xff] }
 0x23b   :  { %3340 = vmatprep.subr.bf16.mxu1 %v3339_v2  ;;  %v3349_v2 = vpack.c.bf16 %v5191_v25, %v5190_v60  ;;  %v5217_v25 = vld [vmem:[#allocation32_spill] sm:$0xff] }
 0x23d   :  { %1356 = vmatmul.mubr.f32.vlgmr.msra.gmra.mrb[0].mxu1 %v5185_v12  ;;  %v3361_v12 = vpack.c.bf16 %v5203_v10, %v5202_v57  ;;  %v4581_v57 = vld [vmem:[#allocation6 + $0xd0] sm:$0xff]  ;;  %v4583_v10 = vld [vmem:[#allocation6 + $0xd8] sm:$0xff] }
 0x23e   :  { %3342 = vmatpush1.bf16.msra.mxu1 %v3341_v15  ;;  %1522 = vmatprep.mubr.f32.mxu1 %v5119_v54  ;;  %v3353_v15 = vpack.c.bf16 %v5195_v40, %v5194_v59 }
 0x23f   :  { %3344 = vmatprep.subr.bf16.mxu1 %v3343_v1  ;;  %v3363_v1 = vpack.c.bf16 %v5205_v24, %v5204_v6  ;;  %v5219_v24 = vld [vmem:[#allocation36_spill] sm:$0xff] }
 0x242   :  { %3346 = vmatpush1.bf16.msra.mxu1 %v3345_v4  ;;  %v3369_v4 = vpack.c.bf16 %v5211_v27, %v5210_v22  ;;  %v5222_v27 = vld [vmem:[#allocation25_spill] sm:$0xff] }
 0x243   :  { %3348 = vmatprep.subr.bf16.mxu1 %v3347_v21 }
 0x246   :  { %3350 = vmatpush1.bf16.msra.mxu1 %v3349_v2  ;;  %v5069_v2 = vand.u32 4294901760, %v5217_v25 }
 0x247   :  { %3352 = vmatprep.subr.bf16.mxu1 %v3351_v56 }
 0x24a   :  { %3354 = vmatpush1.bf16.msra.mxu1 %v3353_v15 }
 0x24b   :  { %3356 = vmatprep.subr.bf16.mxu1 %v3355_v36  ;;  %v1745_v36 = vand.u32 4294901760, %v4555_v42 }
 0x24e   :  { %3358 = vmatpush1.bf16.msra.mxu1 %v3357_v63  ;;  %v4571_v63 = vld [vmem:[#allocation6 + $0x48] sm:$0xff] }
 0x24f   :  { %3360 = vmatprep.subr.bf16.mxu1 %v3359_v49  ;;  %v5093_v22 = vand.u32 4294901760, %v4571_v63 }
 0x252   :  { %3362 = vmatpush1.bf16.msra.mxu1 %v3361_v12 }
 0x253   :  { %3364 = vmatprep.subr.bf16.mxu1 %v3363_v1  ;;  %v5065_v1 = vand.u32 4294901760, %v5219_v24 }
 0x256   :  { %3366 = vmatpush1.bf16.msra.mxu1 %v3365_v46  ;;  %v5221_v46 = vld [vmem:[#allocation24_spill] sm:$0xff] }
 0x257   :  { %3368 = vmatprep.subr.bf16.mxu1 %v3367_v47  ;;  %v5094_v47 = vand.u32 4294901760, %v4569_v58 }
 0x25a   :  { %3370 = vmatpush1.bf16.msra.mxu1 %v3369_v4  ;;  %v4594_v4 = vsub.f32 %v4555_v42, %v1745_v36 }
 0x25b   :  { %3372 = vmatprep.subr.bf16.mxu1 %v5164_v39  ;;  %v5072_v39 = vand.u32 4294901760, %v5214_v3 }
 0x25d   :  { %1524 = vmatmul.mubr.f32.vlgmr.msra.gmra.mrb[0].mxu1 %v4311_v37 }
 0x25e   :  { %3374 = vmatpush1.bf16.msra.mxu1 %v5165_v13  ;;  %1626 = vmatprep.mubr.f32.mxu1 %v5119_v54  ;;  %v5213_v54 = vld [vmem:[#allocation27_spill] sm:$0xff]  ;;  %v1907_v13 = vsub.f32 %v4336_v20, %v5080_v7 }
 0x25f   :  { %3376 = vmatprep.subr.bf16.mxu1 %v5166_v14  ;;  %v5073_v45 = vand.u32 4294901760, %v5213_v54  ;;  %v1788_v14 = vsub.f32 %v4338_v38, %v5075_v53 }
 0x260   :  { %v1908_v60 = vand.u32 4294901760, %v1907_v13  ;;  %v5091_v13 = vand.u32 4294901760, %v4581_v57 }
 0x261   :  { %v1789_v56 = vand.u32 4294901760, %v1788_v14  ;;  %v5090_v14 = vand.u32 4294901760, %v4583_v10 }
 0x262   :  { %3378 = vmatpush1.bf16.msra.mxu1 %v5167_v18  ;;  %v1795_v18 = vsub.f32 %v5212_v51, %v5074_v52 }
 0x263   :  { %3380 = vmatprep.subr.bf16.mxu1 %v3959_v33  ;;  %v1900_v33 = vsub.f32 %v4334_v35, %v5081_v17 }
 0x264   :  { %v1796_v59 = vand.u32 4294901760, %v1795_v18  ;;  %v4603_v18 = vld [vmem:[#allocation6 + $0x50] sm:$0xff] }
 0x265   :  { %v1901_v21 = vand.u32 4294901760, %v1900_v33 }
 0x266   :  { %3382 = vmatpush1.bf16.msra.mxu1 %v5168_v32  ;;  %v5215_v32 = vld [vmem:[#allocation29_spill] sm:$0xff]  ;;  %v3437_v12 = vpack.c.bf16 %v1796_v59, %v1789_v56  ;;  %v1942_v59 = vsub.f32 %v5219_v24, %v5065_v1  ;;  %v5077_v1 = vand.u32 4294901760, %v4594_v4 }
 0x267   :  { %3384 = vmatprep.subr.bf16.mxu1 %v5169_v31  ;;  %v5071_v31 = vand.u32 4294901760, %v5215_v32  ;;  %v3435_v44 = vpack.c.bf16 %v1908_v60, %v1901_v21  ;;  %v1936_v21 = vand.u32 4294901760, %v1935_v9  ;;  %v1816_v60 = vsub.f32 %v4380_v29, %v5067_v8 }
 0x268   :  { %v4625_v9 = vsub.f32 %v4569_v58, %v5094_v47  ;;  %v4644_v8 = vsub.f32 %v4583_v10, %v5090_v14 }
 0x269   :  { %v1802_v40 = vsub.f32 %v5215_v32, %v5071_v31  ;;  %v1817_v19 = vand.u32 4294901760, %v1816_v60 }
 0x26a   :  { %3386 = vmatpush1.bf16.msra.mxu1 %v5170_v55  ;;  %v1914_v55 = vsub.f32 %v5213_v54, %v5073_v45  ;;  %v5087_v53 = vand.u32 4294901760, %v4625_v9  ;;  %v5084_v60 = vand.u32 4294901760, %v4644_v8 }
 0x26b   :  { %3388 = vmatprep.subr.bf16.mxu1 %v5171_v50  ;;  %v1921_v50 = vsub.f32 %v5214_v3, %v5072_v39  ;;  %v1803_v6 = vand.u32 4294901760, %v1802_v40  ;;  %v1949_v40 = vsub.f32 %v5220_v5, %v5064_v41 }
 0x26c   :  { %v1915_v15 = vand.u32 4294901760, %v1914_v55  ;;  %v4605_v55 = vld [vmem:[#allocation6 + $0x58] sm:$0xff] }
 0x26d   :  { %v5088_v41 = vand.u32 4294901760, %v4605_v55  ;;  %v3441_v30 = vpack.c.bf16 %v1810_v43, %v1803_v6  ;;  %v1950_v39 = vand.u32 4294901760, %v1949_v40 }
 0x26e   :  { %3390 = vmatpush1.bf16.msra.mxu1 %v5172_v11  ;;  %v4557_v11 = vld [vmem:[#allocation6 + $0xc8] sm:$0xff] }
 0x26f   :  { %3392 = vmatprep.subr.bf16.mxu1 %v5173_v34  ;;  %v1922_v34 = vand.u32 4294901760, %v1921_v50  ;;  %v5096_v28 = vand.u32 4294901760, %v4557_v11 }
 0x271   :  { %v3439_v16 = vpack.c.bf16 %v1922_v34, %v1915_v15  ;;  %v4599_v33 = vsub.f32 %v4557_v11, %v5096_v28  ;;  %v5223_v15 = vld [vmem:[#allocation39_spill] sm:$0xff] }
 0x272   :  { %3394 = vmatpush1.bf16.msra.mxu1 %v5174_v62  ;;  %v1928_v62 = vsub.f32 %v5217_v25, %v5069_v2  ;;  %v5078_v34 = vand.u32 4294901760, %v5223_v15 }
 0x273   :  { %3396 = vmatprep.subr.bf16.mxu1 %v5175_v61  ;;  %v5218_v61 = vld [vmem:[#allocation35_spill] sm:$0xff] }
 0x274   :  { %v5066_v49 = vand.u32 4294901760, %v5218_v61  ;;  %v1929_v50 = vand.u32 4294901760, %v1928_v62  ;;  %v5076_v62 = vand.u32 4294901760, %v5224_v0  ;;  %v1830_v45 = vsub.f32 %v5223_v15, %v5078_v34 }
 0x276   :  { %3398 = vmatpush1.bf16.msra.mxu1 %v5221_v46  ;;  %v1823_v56 = vsub.f32 %v5218_v61, %v5066_v49  ;;  %v4630_v46 = vsub.f32 %v4571_v63, %v5093_v22  ;;  %v5079_v49 = vand.u32 4294901760, %v4599_v33  ;;  %v3443_v2 = vpack.c.bf16 %v1936_v21, %v1929_v50 }
 0x277   :  { %3400 = vmatprep.subr.bf16.mxu1 %v5222_v27  ;;  %v5089_v27 = vand.u32 4294901760, %v4603_v18  ;;  %v1837_v52 = vsub.f32 %v5224_v0, %v5076_v62  ;;  %v1956_v50 = vsub.f32 %v4594_v4, %v5077_v1  ;;  %v1831_v40 = vand.u32 4294901760, %v1830_v45 }
 0x278   :  { %v1824_v31 = vand.u32 4294901760, %v1823_v56  ;;  %v5083_v6 = vand.u32 4294901760, %v4630_v46  ;;  %v1977_v45 = vsub.f32 %v4644_v8, %v5084_v60 }
 0x279   :  { %v4658_v43 = vsub.f32 %v4603_v18, %v5089_v27  ;;  %v1838_v62 = vand.u32 4294901760, %v1837_v52  ;;  %v1957_v7 = vand.u32 4294901760, %v1956_v50 }
 0x27a   :  { %3402 = vmatpush1.bf16.msra.mxu1 %v5180_v23  ;;  %v4639_v23 = vsub.f32 %v4581_v57, %v5091_v13  ;;  %v3445_v56 = vpack.c.bf16 %v1824_v31, %v1817_v19  ;;  %v1851_v1 = vsub.f32 %v4630_v46, %v5083_v6 }
 0x27b   :  { %3436 = vmatprep.subr.bf16.mxu1 %v3435_v44  ;;  %v1943_v44 = vand.u32 4294901760, %v1942_v59  ;;  %v5086_v34 = vand.u32 4294901760, %v4658_v43 }
 0x27c   :  { %v5082_v21 = vand.u32 4294901760, %v4639_v23  ;;  %v1852_v19 = vand.u32 4294901760, %v1851_v1 }
 0x27d   :  { %1628 = vmatmul.mubr.f32.vlgmr.msra.gmra.mrb[0].mxu1 %v4311_v37  ;;  %v4663_v37 = vsub.f32 %v4605_v55, %v5088_v41  ;;  %v3447_v59 = vpack.c.bf16 %v1950_v39, %v1943_v44  ;;  %v3449_v39 = vpack.c.bf16 %v1838_v62, %v1831_v40  ;;  %v4695_v40 = vld [vmem:[#allocation6 + $0xe8] sm:$0xff] }
 0x27e   :  { %3438 = vmatpush3.bf16.msra.mxu1 %v3437_v12  ;;  %v1963_v12 = vsub.f32 %v4599_v33, %v5079_v49  ;;  %v1970_v52 = vsub.f32 %v4639_v23, %v5082_v21 }
 0x27f   :  { %5225 = vst [vmem:[#allocation9_spill] sm:$0xff] %v4663_v37  ;;  %3440 = vmatprep.subr.bf16.mxu1 %v3439_v16  ;;  %v1844_v16 = vsub.f32 %v4625_v9, %v5087_v53  ;;  %v5085_v49 = vand.u32 4294901760, %v4663_v37 }
 0x280   :  { %v1964_v17 = vand.u32 4294901760, %v1963_v12  ;;  %v1971_v50 = vand.u32 4294901760, %v1970_v52  ;;  %v1978_v12 = vand.u32 4294901760, %v1977_v45 }
 0x281   :  { %v1845_v31 = vand.u32 4294901760, %v1844_v16 }
 0x282   :  { %3442 = vmatpush3.bf16.msra.mxu1 %v3441_v30  ;;  %v1858_v30 = vsub.f32 %v4658_v43, %v5086_v34  ;;  %v3451_v44 = vpack.c.bf16 %v1964_v17, %v1957_v7  ;;  %v3455_v62 = vpack.c.bf16 %v1978_v12, %v1971_v50  ;;  %v1760_v17 = vand.u32 4294901760, %v4695_v40  ;;  %v1648_v7 = vld [vmem:[#allocation6 + $0x60] sm:$0xff]  ;;  %v1650_v12 = vld [vmem:[#allocation6 + $0x70] sm:$0xff] }
 0x283   :  { %3444 = vmatprep.subr.bf16.mxu1 %v3443_v2  ;;  %v1865_v2 = vsub.f32 %v4663_v37, %v5085_v49  ;;  %v3453_v21 = vpack.c.bf16 %v1852_v19, %v1845_v31  ;;  %v1709_v52 = vand.u32 4294901760, %v1648_v7  ;;  %v1666_v31 = vld [vmem:[#allocation6 + $0xf0] sm:$0xff]  ;;  %v1667_v19 = vld [vmem:[#allocation6 + $0xf8] sm:$0xff] }
 0x284   :  { %v1859_v6 = vand.u32 4294901760, %v1858_v30  ;;  %v1766_v50 = vand.u32 4294901760, %v1667_v19 }
 0x285   :  { %v1866_v60 = vand.u32 4294901760, %v1865_v2 }
 0x286   :  { %3446 = vmatpush3.bf16.msra.mxu1 %v3445_v56  ;;  %v4693_v56 = vld [vmem:[#allocation6 + $0xe0] sm:$0xff]  ;;  %v4721_v53 = vsub.f32 %v1667_v19, %v1766_v50 }
 0x287   :  { %3448 = vmatprep.subr.bf16.mxu1 %v3447_v59  ;;  %v3457_v1 = vpack.c.bf16 %v1866_v60, %v1859_v6  ;;  %v1757_v16 = vand.u32 4294901760, %v4693_v56  ;;  %v1649_v59 = vld [vmem:[#allocation6 + $0x68] sm:$0xff]  ;;  %v4705_v6 = vsub.f32 %v1648_v7, %v1709_v52 }
 0x288   :  { %v1712_v45 = vand.u32 4294901760, %v1649_v59  ;;  %v5102_v19 = vand.u32 4294901760, %v4721_v53 }
 0x28a   :  { %3450 = vmatpush3.bf16.msra.mxu1 %v3449_v39  ;;  %v4700_v39 = vsub.f32 %v4693_v56, %v1757_v16  ;;  %v4707_v60 = vsub.f32 %v1649_v59, %v1712_v45  ;;  %v2005_v42 = vsub.f32 %v4721_v53, %v5102_v19 }
 0x28b   :  { %3452 = vmatprep.subr.bf16.mxu1 %v3451_v44  ;;  %v1763_v44 = vand.u32 4294901760, %v1666_v31 }
 0x28c   :  { %v5092_v30 = vand.u32 4294901760, %v4700_v39  ;;  %v5104_v56 = vand.u32 4294901760, %v4707_v60 }
 0x28d   :  { %v4719_v34 = vsub.f32 %v1666_v31, %v1763_v44 }
 0x28e   :  { %3454 = vmatpush3.bf16.msra.mxu1 %v3453_v21  ;;  %v4703_v21 = vsub.f32 %v4695_v40, %v1760_v17  ;;  %v1715_v40 = vand.u32 4294901760, %v1650_v12  ;;  %v1984_v7 = vsub.f32 %v4700_v39, %v5092_v30  ;;  %v1879_v27 = vsub.f32 %v4707_v60, %v5104_v56  ;;  %v5241_v56 = vld [vmem:[#allocation43_spill] sm:$0xff] }
 0x28f   :  { %3456 = vmatprep.subr.bf16.mxu1 %v3455_v62  ;;  %v1651_v62 = vld [vmem:[#allocation6 + $0x78] sm:$0xff]  ;;  %v5103_v22 = vand.u32 4294901760, %v4719_v34 }
 0x290   :  { %v5095_v2 = vand.u32 4294901760, %v4703_v21  ;;  %v1718_v49 = vand.u32 4294901760, %v1651_v62  ;;  %v4729_v14 = vsub.f32 %v1650_v12, %v1715_v40  ;;  %v1985_v13 = vand.u32 4294901760, %v1984_v7 }
 0x291   :  { %v1998_v7 = vsub.f32 %v4719_v34, %v5103_v22  ;;  %v5240_v22 = vld [vmem:[#allocation42_spill] sm:$0xff] }
 0x292   :  { %3458 = vmatpush3.bf16.msra.mxu1 %v3457_v1  ;;  %v5097_v1 = vand.u32 4294901760, %v4705_v6  ;;  %v1991_v59 = vsub.f32 %v4703_v21, %v5095_v2  ;;  %v4732_v47 = vsub.f32 %v1651_v62, %v1718_v49  ;;  %v1880_v2 = vand.u32 4294901760, %v1879_v27 }
 0x293   :  { %v5101_v28 = vand.u32 4294901760, %v4729_v14  ;;  %v5227_v62 = vand.u32 4294901760, %v4569_v58  ;;  %v2006_v58 = vand.u32 4294901760, %v2005_v42  ;;  %v4779_v42 = vpack.c.bf16 %v1712_v45, %v1709_v52 }
 0x294   :  { %v1872_v41 = vsub.f32 %v4705_v6, %v5097_v1  ;;  %v1992_v30 = vand.u32 4294901760, %v1991_v59  ;;  %v5226_v1 = vand.u32 4294901760, %v4557_v11  ;;  %v3493_v52 = vpack.c.bf16 %v4707_v60, %v4705_v6 }
 0x295   :  { %v1886_v11 = vsub.f32 %v4729_v14, %v5101_v28  ;;  %v3495_v45 = vpack.c.bf16 %v4721_v53, %v4719_v34 }
 0x296   :  { %v1873_v31 = vand.u32 4294901760, %v1872_v41  ;;  %v4740_v37 = vpack.c.bf16 %v5226_v1, %v1745_v36  ;;  %v3459_v12 = vpack.c.bf16 %v1992_v30, %v1985_v13  ;;  %v5228_v41 = vand.u32 4294901760, %v4571_v63 }
 0x297   :  { %v1999_v36 = vand.u32 4294901760, %v1998_v7  ;;  %v5100_v13 = vand.u32 4294901760, %v4732_v47  ;;  %v5229_v63 = vand.u32 4294901760, %v4581_v57  ;;  %v5230_v30 = vand.u32 4294901760, %v4583_v10 }
 0x298   :  { %v4749_v27 = vpack.c.bf16 %v5228_v41, %v5227_v62  ;;  %v3461_v59 = vpack.c.bf16 %v1880_v2, %v1873_v31  ;;  %3420 = vmatprep.subr.bf16.mxu0 %v4740_v37  ;;  %3460 = vmatprep.subr.bf16.mxu1 %v3459_v12  ;;  %v1887_v1 = vand.u32 4294901760, %v1886_v11  ;;  %v5231_v12 = vand.u32 4294901760, %v4603_v18  ;;  %v5233_v11 = vld [vmem:[#allocation31_spill] sm:$0xff] }
 0x299   :  { %v4764_v2 = vpack.c.bf16 %v5230_v30, %v5229_v63  ;;  %v1893_v31 = vsub.f32 %v4732_v47, %v5100_v13  ;;  %v3463_v62 = vpack.c.bf16 %v2006_v58, %v1999_v36  ;;  %v5232_v7 = vand.u32 4294901760, %v4605_v55  ;;  %v5235_v36 = vld [vmem:[#allocation16_spill] sm:$0xff] }
 0x29a   :  { %3422 = vmatpush3.bf16.msra.mxu0 %v4749_v27  ;;  %3462 = vmatpush3.bf16.msra.mxu1 %v3461_v59  ;;  %v4777_v10 = vpack.c.bf16 %v1760_v17, %v1757_v16  ;;  %v4784_v18 = vpack.c.bf16 %v1766_v50, %v1763_v44  ;;  %v4786_v55 = vpack.c.bf16 %v1718_v49, %v1715_v40  ;;  %v5234_v44 = vld [vmem:[#allocation15_spill] sm:$0xff] }
 0x29b   :  { %v4773_v41 = vpack.c.bf16 %v5232_v7, %v5231_v12  ;;  %3424 = vmatprep.subr.bf16.mxu0 %v4764_v2  ;;  %v1894_v59 = vand.u32 4294901760, %v1893_v31  ;;  %3464 = vmatprep.subr.bf16.mxu1 %v3463_v62  ;;  %v3467_v16 = vpack.c.bf16 %v4336_v20, %v4334_v35  ;;  %v3491_v17 = vpack.c.bf16 %v4703_v21, %v4700_v39 }
 0x29c   :  { %v3497_v49 = vpack.c.bf16 %v4732_v47, %v4729_v14  ;;  %v763_v50 = vsub.s32 1, %v5234_v44  ;;  %v767_v40 = vsub.s32 5, %v5234_v44 }
 0x29d   :  { %v3465_v57 = vpack.c.bf16 %v1894_v59, %v1887_v1 }
 0x29e   :  { %3426 = vmatpush3.bf16.msra.mxu0 %v4773_v41  ;;  %v764_v58 = vrot.slane %v5235_v36, %v763_v50  ;;  %v768_v63 = vrot.slane %v5235_v36, %v767_v40 }
 0x29f   :  { %3466 = vmatpush3.bf16.msra.mxu1 %v3465_v57  ;;  %3428 = vmatprep.subr.bf16.mxu0 %v4777_v10 }
 0x2a0   :  { %3500 = vmatprep.subr.bf16.mxu1 %v5233_v11  ;;  %v774_v30 = vrot.slane %v764_v58, %v763_v50  ;;  %v778_v1 = vrot.slane %v768_v63, %v763_v50  ;;  %v5236_v50 = vld [vmem:[#allocation33_spill] sm:$0xff] }
 0x2a2   :  { %3430 = vmatpush3.bf16.msra.mxu0 %v4779_v42 }
 0x2a3   :  { %3432 = vmatprep.subr.bf16.mxu0 %v4784_v18 }
 0x2a6   :  { %3434 = vmatpush3.bf16.msra.mxu0 %v4786_v55 }
 0x2a7   :  { %3468 = vmatprep.subr.bf16.mxu0 %v3467_v16 }
 0x350   :  { %v1629_v31 = vpop.f32.mrb[0].mxu1 }
 0x351   :  { %v3596_v62 = vadd.f32 %v1629_v31, %v774_v30  ;;  %v1631_v12 = vpop.f32.mrb[1].mxu1  ;;  %v5237_v30 = vld [vmem:[#allocation34_spill] sm:$0xff]  ;;  %v5238_v31 = vld [vmem:[#allocation37_spill] sm:$0xff] }
 0x352   :  { %v3597_v7 = vadd.f32 %v1631_v12, %v778_v1  ;;  %v3469_v12 = vpack.c.bf16 %v5212_v51, %v4338_v38 }
 0x353   :  { %v1634_v59 = vmax.f32 %v3596_v62, 0.0 }
 0x354   :  { %v1635_v57 = vmax.f32 %v3597_v7, 0.0  ;;  %v5239_v7 = vld [vmem:[#allocation41_spill] sm:$0xff] }
 0x355   :  { %v4804_v16 = vand.u32 4294901760, %v1634_v59 }
 0x356   :  { %v4806_v13 = vand.u32 4294901760, %v1635_v57 }
 0x357   :  { %v4809_v28 = vsub.f32 %v1634_v59, %v4804_v16 }
 0x358   :  { %v1769_v19 = vsub.f32 %v1635_v57, %v4806_v13  ;;  %2009 = vmatprep.mubr.f32.mxu1 %v4806_v13  ;;  %v3471_v57 = vpack.c.bf16 %v5214_v3, %v5213_v54 }
 0x359   :  { %v1776_v40 = vand.u32 4294901760, %v4809_v28  ;;  %2011 = vmatmul.mubr.f32.vlgmr.msra.gmra.mrb[2].mxu1 %v4804_v16 }
 0x35a   :  { %3502 = vmatpush3.bf16.msra.mxu1 %v5236_v50  ;;  %v1770_v58 = vand.u32 4294901760, %v1769_v19 }
 0x35b   :  { %v1777_v63 = vsub.f32 %v4809_v28, %v1776_v40  ;;  %3504 = vmatprep.subr.bf16.mxu1 %v5237_v30 }
 0x35c   :  { %2253 = vmatprep.mubr.f32.mxu1 %v1770_v58  ;;  %v1771_v1 = vsub.f32 %v1769_v19, %v1770_v58  ;;  %v3473_v58 = vpack.c.bf16 %v5216_v48, %v5215_v32 }
 0x35d   :  { %v1778_v59 = vand.u32 4294901760, %v1777_v63  ;;  %v5242_v63 = vld [vmem:[#allocation44_spill] sm:$0xff] }
 0x35e   :  { %3506 = vmatpush3.bf16.msra.mxu1 %v5238_v31  ;;  %v1772_v62 = vand.u32 4294901760, %v1771_v1  ;;  %v3475_v1 = vpack.c.bf16 %v4375_v26, %v5217_v25 }
 0x35f   :  { %3508 = vmatprep.subr.bf16.mxu1 %v5239_v7 }
 0x360   :  { %1773 = vmatprep.mubr.f32.mxu0 %v1772_v62  ;;  %v3477_v62 = vpack.c.bf16 %v5218_v61, %v4380_v29 }
 0x361   :  { %1779 = vmatmul.mubr.f32.vlgmr.msra.gmra.mrb[2].mxu0 %v1778_v59  ;;  %v3483_v59 = vpack.c.bf16 %v4599_v33, %v4594_v4 }
 0x362   :  { %3470 = vmatpush3.bf16.msra.mxu0 %v3469_v12  ;;  %3510 = vmatpush3.bf16.msra.mxu1 %v5240_v22  ;;  %v3479_v12 = vpack.c.bf16 %v5220_v5, %v5219_v24 }
 0x363   :  { %2146 = vmatprep.mubr.f32.mxu0 %v1769_v19  ;;  %3472 = vmatprep.subr.bf16.mxu0 %v3471_v57  ;;  %v3481_v19 = vpack.c.bf16 %v5224_v0, %v5223_v15  ;;  %v3485_v57 = vpack.c.bf16 %v4630_v46, %v4625_v9 }
 0x364   :  { %3512 = vmatprep.subr.bf16.mxu1 %v5241_v56 }
 0x366   :  { %3474 = vmatpush3.bf16.msra.mxu0 %v3473_v58  ;;  %3514 = vmatpush3.bf16.msra.mxu1 %v5242_v63  ;;  %v3487_v58 = vpack.c.bf16 %v4644_v8, %v4639_v23 }
 0x367   :  { %3476 = vmatprep.subr.bf16.mxu0 %v3475_v1  ;;  %3516 = vmatprep.subr.bf16.mxu1 %v4740_v37  ;;  %v5243_v1 = vld [vmem:[#allocation9_spill] sm:$0xff] }
 0x36a   :  { %3478 = vmatpush3.bf16.msra.mxu0 %v3477_v62  ;;  %3518 = vmatpush3.bf16.msra.mxu1 %v4749_v27  ;;  %v3489_v62 = vpack.c.bf16 %v5243_v1, %v4658_v43 }
 0x36b   :  { %3480 = vmatprep.subr.bf16.mxu0 %v3479_v12  ;;  %3520 = vmatprep.subr.bf16.mxu1 %v4764_v2  ;;  %v5244_v12 = vand.u32 4294901760, %v4334_v35  ;;  %v5248_v35 = vand.u32 4294901760, %v5213_v54  ;;  %v5253_v54 = vand.u32 4294901760, %v4375_v26  ;;  %v5258_v26 = vand.u32 4294901760, %v5223_v15 }
 0x36c   :  { %v5264_v15 = vand.u32 4294901760, %v4639_v23  ;;  %v5271_v23 = vand.u32 4294901760, %v4707_v60 }
 0x36e   :  { %3482 = vmatpush3.bf16.msra.mxu0 %v3481_v19  ;;  %3522 = vmatpush3.bf16.msra.mxu1 %v4773_v41  ;;  %v5245_v19 = vand.u32 4294901760, %v4336_v20  ;;  %v5249_v20 = vand.u32 4294901760, %v5214_v3  ;;  %v5254_v3 = vand.u32 4294901760, %v4380_v29  ;;  %v5260_v29 = vand.u32 4294901760, %v4594_v4 }
 0x36f   :  { %3484 = vmatprep.subr.bf16.mxu0 %v3483_v59  ;;  %3524 = vmatprep.subr.bf16.mxu1 %v4777_v10  ;;  %v5266_v4 = vand.u32 4294901760, %v4658_v43  ;;  %v5272_v43 = vand.u32 4294901760, %v4719_v34  ;;  %v1670_v34 = vsub.s32 2, %v5234_v44 }
 0x372   :  { %3486 = vmatpush3.bf16.msra.mxu0 %v3485_v57  ;;  %3526 = vmatpush3.bf16.msra.mxu1 %v4779_v42 }
 0x373   :  { %3488 = vmatprep.subr.bf16.mxu0 %v3487_v58  ;;  %3528 = vmatprep.subr.bf16.mxu1 %v4784_v18 }
 0x376   :  { %3490 = vmatpush3.bf16.msra.mxu0 %v3489_v62  ;;  %3530 = vmatpush3.bf16.msra.mxu1 %v4786_v55 }
 0x377   :  { %3492 = vmatprep.subr.bf16.mxu0 %v3491_v17  ;;  %3564 = vmatprep.subr.bf16.mxu1 %v5233_v11  ;;  %v3531_v17 = vpack.c.bf16 %v5245_v19, %v5244_v12  ;;  %v5246_v11 = vand.u32 4294901760, %v4338_v38  ;;  %v5251_v38 = vand.u32 4294901760, %v5216_v48  ;;  %v5257_v48 = vand.u32 4294901760, %v5220_v5 }
 0x378   :  { %v5263_v5 = vand.u32 4294901760, %v4630_v46  ;;  %v5269_v46 = vand.u32 4294901760, %v4703_v21  ;;  %v5275_v21 = vand.u32 4294901760, %v4732_v47 }
 0x379   :  { %2257 = vmatmul.mubr.f32.vlgmr.msra.gmra.mrb[4].mxu1 %v1776_v40 }
 0x37a   :  { %3494 = vmatpush3.bf16.msra.mxu0 %v3493_v52  ;;  %3566 = vmatpush3.bf16.msra.mxu1 %v5236_v50  ;;  %v5247_v52 = vand.u32 4294901760, %v5212_v51  ;;  %v5252_v51 = vand.u32 4294901760, %v5217_v25  ;;  %v5259_v25 = vand.u32 4294901760, %v5224_v0  ;;  %v5265_v0 = vand.u32 4294901760, %v4644_v8 }
 0x37b   :  { %2527 = vmatprep.mubr.f32.mxu1 %v4806_v13  ;;  %3496 = vmatprep.subr.bf16.mxu0 %v3495_v45  ;;  %v3535_v45 = vpack.c.bf16 %v5249_v20, %v5248_v35  ;;  %v5270_v8 = vand.u32 4294901760, %v4705_v6 }
 0x37c   :  { %3568 = vmatprep.subr.bf16.mxu1 %v5237_v30  ;;  %v3533_v40 = vpack.c.bf16 %v5247_v52, %v5246_v11  ;;  %v3539_v30 = vpack.c.bf16 %v5253_v54, %v5252_v51 }
 0x37e   :  { %3498 = vmatpush3.bf16.msra.mxu0 %v3497_v49  ;;  %3570 = vmatpush3.bf16.msra.mxu1 %v5238_v31  ;;  %v5250_v49 = vand.u32 4294901760, %v5215_v32  ;;  %v5256_v32 = vand.u32 4294901760, %v5219_v24  ;;  %v5262_v24 = vand.u32 4294901760, %v4625_v9  ;;  %v5268_v9 = vand.u32 4294901760, %v4700_v39 }
 0x37f   :  { %3532 = vmatprep.subr.bf16.mxu0 %v3531_v17  ;;  %3572 = vmatprep.subr.bf16.mxu1 %v5239_v7  ;;  %v5274_v39 = vand.u32 4294901760, %v4729_v14 }
 0x380   :  { %v3537_v50 = vpack.c.bf16 %v5251_v38, %v5250_v49 }
 0x381   :  { %2149 = vmatmul.mubr.f32.vlgmr.msra.gmra.mrb[4].mxu0 %v4809_v28  ;;  %v5255_v28 = vand.u32 4294901760, %v5218_v61  ;;  %v5261_v61 = vand.u32 4294901760, %v4599_v33  ;;  %v5267_v33 = vand.u32 4294901760, %v5243_v1 }
 0x382   :  { %3534 = vmatpush3.bf16.msra.mxu0 %v3533_v40  ;;  %2423 = vmatprep.mubr.f32.mxu0 %v4806_v13 }
 0x383   :  { %3574 = vmatpush3.bf16.msra.mxu1 %v5240_v22  ;;  %3536 = vmatprep.subr.bf16.mxu0 %v3535_v45  ;;  %v3541_v13 = vpack.c.bf16 %v5255_v28, %v5254_v3  ;;  %v3543_v22 = vpack.c.bf16 %v5257_v48, %v5256_v32  ;;  %v3547_v31 = vpack.c.bf16 %v5261_v61, %v5260_v29 }
 0x384   :  { %3576 = vmatprep.subr.bf16.mxu1 %v5241_v56  ;;  %v3545_v56 = vpack.c.bf16 %v5259_v25, %v5258_v26 }
 0x386   :  { %3538 = vmatpush3.bf16.msra.mxu0 %v3537_v50 }
 0x387   :  { %3578 = vmatpush3.bf16.msra.mxu1 %v5242_v63  ;;  %3540 = vmatprep.subr.bf16.mxu0 %v3539_v30 }
 0x388   :  { %3580 = vmatprep.subr.bf16.mxu1 %v4740_v37  ;;  %v3549_v37 = vpack.c.bf16 %v5263_v5, %v5262_v24 }
 0x38a   :  { %3542 = vmatpush3.bf16.msra.mxu0 %v3541_v13 }
 0x38b   :  { %3582 = vmatpush3.bf16.msra.mxu1 %v4749_v27  ;;  %3544 = vmatprep.subr.bf16.mxu0 %v3543_v22  ;;  %v3551_v27 = vpack.c.bf16 %v5265_v0, %v5264_v15 }
 0x38c   :  { %3584 = vmatprep.subr.bf16.mxu1 %v4764_v2  ;;  %v3553_v2 = vpack.c.bf16 %v5267_v33, %v5266_v4 }
 0x38e   :  { %3546 = vmatpush3.bf16.msra.mxu0 %v3545_v56 }
 0x38f   :  { %3586 = vmatpush3.bf16.msra.mxu1 %v4773_v41  ;;  %3548 = vmatprep.subr.bf16.mxu0 %v3547_v31  ;;  %v3555_v41 = vpack.c.bf16 %v5269_v46, %v5268_v9 }
 0x390   :  { %3588 = vmatprep.subr.bf16.mxu1 %v4777_v10  ;;  %v3557_v10 = vpack.c.bf16 %v5271_v23, %v5270_v8 }
 0x392   :  { %3550 = vmatpush3.bf16.msra.mxu0 %v3549_v37 }
 0x393   :  { %3590 = vmatpush3.bf16.msra.mxu1 %v4779_v42  ;;  %3552 = vmatprep.subr.bf16.mxu0 %v3551_v27  ;;  %v5273_v42 = vand.u32 4294901760, %v4721_v53  ;;  %v1671_v53 = vrot.slane %v5235_v36, %v1670_v34 }
 0x394   :  { %3592 = vmatprep.subr.bf16.mxu1 %v4784_v18  ;;  %v3561_v18 = vpack.c.bf16 %v5275_v21, %v5274_v39 }
 0x395   :  { %v3559_v7 = vpack.c.bf16 %v5273_v42, %v5272_v43 }
 0x396   :  { %3554 = vmatpush3.bf16.msra.mxu0 %v3553_v2 }
 0x397   :  { %3594 = vmatpush3.bf16.msra.mxu1 %v4786_v55  ;;  %3556 = vmatprep.subr.bf16.mxu0 %v3555_v41 }
 0x39a   :  { %2529 = vmatmul.mubr.f32.vlgmr.msra.gmra.mrb[6].mxu1 %v4804_v16  ;;  %3558 = vmatpush3.bf16.msra.mxu0 %v3557_v10 }
 0x39b   :  { %3560 = vmatprep.subr.bf16.mxu0 %v3559_v7 }
 0x39e   :  { %3562 = vmatpush3.bf16.msra.mxu0 %v3561_v18 }
 0x3a1   :  { %2425 = vmatmul.mubr.f32.vlgmr.msra.gmra.mrb[6].mxu0 %v4804_v16 }
 0x42c   :  { %v2714_v6 = vpop.f32.mrb[2].mxu1 }
 0x42d   :  { %v2715_v60 = vpop.f32.mrb[3].mxu1 }
 0x42e   :  { %v2716_v55 = vadd.f32 %v2715_v60, %v2714_v6 }
 0x434   :  { %v2679_v63 = vpop.f32.mrb[2].mxu0 }
 0x435   :  { %v2680_v59 = vpop.f32.mrb[3].mxu0 }
 0x436   :  { %v2681_v57 = vadd.f32 %v2680_v59, %v2679_v63 }
 0x438   :  { %v1781_v58 = vadd.f32 %v2681_v57, %v1671_v53 }
 0x43a   :  { %v2013_v1 = vadd.f32 %v2716_v55, %v1781_v58 }
 0x44c   :  { %v2784_v14 = vpop.f32.mrb[4].mxu1 }
 0x44d   :  { %v2785_v62 = vpop.f32.mrb[5].mxu1 }
 0x44e   :  { %v2786_v47 = vadd.f32 %v2785_v62, %v2784_v14 }
 0x454   :  { %v2749_v12 = vpop.f32.mrb[4].mxu0 }
 0x455   :  { %v2750_v19 = vpop.f32.mrb[5].mxu0 }
 0x456   :  { %v2751_v17 = vadd.f32 %v2750_v19, %v2749_v12 }
 0x458   :  { %v2151_v11 = vadd.f32 %v2751_v17, %v2013_v1 }
 0x45a   :  { %v2259_v16 = vadd.f32 %v2786_v47, %v2151_v11 }
 0x46d   :  { %v2854_v52 = vpop.f32.mrb[6].mxu1 }
 0x46e   :  { %v2855_v40 = vpop.f32.mrb[7].mxu1 }
 0x46f   :  { %v2856_v35 = vadd.f32 %v2855_v40, %v2854_v52 }
 0x474   :  { %v2819_v20 = vpop.f32.mrb[6].mxu0 }
 0x475   :  { %v2820_v44 = vpop.f32.mrb[7].mxu0 }
 0x476   :  { %v2821_v45 = vadd.f32 %v2820_v44, %v2819_v20 }
 0x478   :  { %v2427_v49 = vadd.f32 %v2821_v45, %v2259_v16 }
 0x47a   :  { %v2531_v36 = vadd.f32 %v2856_v35, %v2427_v49 }
 0x47c   :  { %2534 = vst [vmem:[%s4960_s5] sm:$0xff] %v2531_v36 }
 0x47d   :  { %2543 = vsyncpa [#allocation3], 1 }
 0x47e   :  { %2544 = vsyncpa [#allocation5], 1 }

</bundles_post_ra>
